<compile_context>
chip_gen: v6e
topology: v6e:2x2x1
jax: 0.10.0
libtpu: 0.0.40
codegen_flags: <defaults>
</compile_context>

<pallas_src>
import functools

import numpy as np
import jax
import jax.numpy as jnp
from jax.experimental import pallas as pl
from jax.experimental.pallas import tpu as pltpu


def _silu(x):
    # explicit exp/div formulation (EUP-friendly, identical in kernel & ref)
    return x * (1.0 / (1.0 + jnp.exp(-x)))


def _make_tap_masks(H, W):
    """(9, 1, H*W) 0/1 bf16 masks: tap (dh,dw) is valid iff its source pixel
    lies inside the image (handles both the row-wrap of the lane roll and the
    left/right SAME-padding border)."""
    L = H * W
    masks = np.zeros((9, 1, L), np.float32)
    for dh in range(3):
        for dw in range(3):
            m = np.zeros((H, W), np.float32)
            hs = slice(max(0, 1 - dh), H - max(0, dh - 1))
            ws = slice(max(0, 1 - dw), W - max(0, dw - 1))
            m[hs, ws] = 1.0
            masks[dh * 3 + dw, 0] = m.reshape(L)
    return jnp.asarray(masks, dtype=jnp.bfloat16)


# ----------------------------------------------------------------------------
# Fused kernel: whole forward for ONE image per grid step.
#   patches : (1, 9, L)      f32   (stem stride-2 im2col, Cin=1)
#   masks   : (9, 1, L)      bf16  (3x3 boundary masks)
#   stem_w  : (32, 9)        bf16   stem_b : (32, 1)   f32
#   blk_w   : (32, 288)      bf16   blk_b  : (32, 1)   f32
#   head_w  : (128, 32)      bf16   head_b : (128, 1)  f32
#   fc_w    : (128, 2)       f32    fc_b   : (1, 2)    f32
#   o       : (1, 1, 2)      f32
#   tap_buf : VMEM (288, L)  bf16 scratch (9 taps x 32 channels)
# ----------------------------------------------------------------------------
def _fused_kernel(patches_ref, masks_ref, stem_w_ref, stem_b_ref,
                  blk_w_ref, blk_b_ref, head_w_ref, head_b_ref,
                  fc_w_ref, fc_b_ref, o_ref, tap_buf, *, W):
    L = patches_ref.shape[2]
    cin = stem_w_ref.shape[0]                      # stem/block channels (32)

    # ---- stem: 3x3 stride-2 conv (K=9 GEMM) + folded-BN bias + SiLU --------
    p = patches_ref[0].astype(jnp.bfloat16)                         # (9, L)
    stem = _silu(jnp.dot(stem_w_ref[...], p,
                         preferred_element_type=jnp.float32)
                 + stem_b_ref[...])                                  # (cin, L) f32

    # ---- stage-1 FusedMBConv(expand=1, k3, s1): conv3x3+BN+SiLU + identity -
    # Taps via lane rolls; cast-to-bf16 BEFORE the bf16 mask multiply; each
    # masked tap is retired straight into the VMEM scratch slab.
    masks = masks_ref[...]                                           # (9, 1, L)
    for dh in range(3):
        for dw in range(3):
            t = dh * 3 + dw
            off = (dh - 1) * W + (dw - 1)                            # flat offset
            rolled = stem if off == 0 else pltpu.roll(stem, shift=(-off) % L,
                                                      axis=1)
            tap = rolled.astype(jnp.bfloat16) * masks[t]             # (cin, L)
            tap_buf[pl.ds(t * cin, cin), :] = tap
    blk = _silu(jnp.dot(blk_w_ref[...], tap_buf[...],
                        preferred_element_type=jnp.float32)
                + blk_b_ref[...]) + stem                             # f32 residual

    # ---- head: 1x1 conv cin -> C_HEAD + BN + SiLU ---------------------------
    head = _silu(jnp.dot(head_w_ref[...], blk.astype(jnp.bfloat16),
                         preferred_element_type=jnp.float32)
                 + head_b_ref[...])                                  # (C_HEAD, L)

    # ---- global avg pool + dropout(eval: identity) + Linear(C_HEAD, 2) ------
    pooled = jnp.mean(head, axis=1, keepdims=True)                   # (C_HEAD, 1)
    out = jnp.sum(fc_w_ref[...] * pooled, axis=0, keepdims=True) + fc_b_ref[...]
    o_ref[0] = out                                                   # (1, n_out)


# ----------------------------------------------------------------------------
# Full forward (mirrors FocusRegressorEfficientNetV2L.forward, reduced scale)
# ----------------------------------------------------------------------------
def focus_regressor_forward(x_nchw, params):
    N, _, H, W = x_nchw.shape
    Ho, Wo = H // 2, W // 2
    L = Ho * Wo
    cin = params["stem_w"].shape[0]
    c_head, n_out = params["fc_w"].shape

    # Stem stride-2 im2col in the wrapper (Cin=1 -> 9 scalars / output pixel).
    # TODO(synk): at real EfficientNetV2-L resolutions build these patches
    #             in-kernel (strided DMA / rolls) to avoid the 9x HBM copy.
    xp = jnp.pad(x_nchw[:, 0], ((0, 0), (1, 1), (1, 1)))             # (N,H+2,W+2)
    patches = jnp.stack(
        [xp[:, dh:dh + 2 * Ho:2, dw:dw + 2 * Wo:2]
         for dh in range(3) for dw in range(3)], axis=1).reshape(N, 9, L)

    masks = _make_tap_masks(Ho, Wo)

    kernel = functools.partial(_fused_kernel, W=Wo)
    out = pl.pallas_call(
        kernel,
        out_shape=jax.ShapeDtypeStruct((N, 1, n_out), jnp.float32),
        grid_spec=pltpu.PrefetchScalarGridSpec(
            num_scalar_prefetch=0,
            grid=(N,),
            in_specs=[
                pl.BlockSpec((1, 9, L), lambda n: (n, 0, 0)),
                pl.BlockSpec((9, 1, L), lambda n: (0, 0, 0)),
                pl.BlockSpec(params["stem_w"].shape, lambda n: (0, 0)),
                pl.BlockSpec(params["stem_b"].shape, lambda n: (0, 0)),
                pl.BlockSpec(params["blk_w"].shape, lambda n: (0, 0)),
                pl.BlockSpec(params["blk_b"].shape, lambda n: (0, 0)),
                pl.BlockSpec(params["head_w"].shape, lambda n: (0, 0)),
                pl.BlockSpec(params["head_b"].shape, lambda n: (0, 0)),
                pl.BlockSpec(params["fc_w"].shape, lambda n: (0, 0)),
                pl.BlockSpec(params["fc_b"].shape, lambda n: (0, 0)),
            ],
            out_specs=pl.BlockSpec((1, 1, n_out), lambda n: (n, 0, 0)),
            scratch_shapes=[pltpu.VMEM((9 * cin, L), jnp.bfloat16)],
        ),
        compiler_params=pltpu.CompilerParams(
            dimension_semantics=("parallel",)),
    )(patches, masks, params["stem_w"], params["stem_b"],
      params["blk_w"], params["blk_b"], params["head_w"], params["head_b"],
      params["fc_w"], params["fc_b"])
    return out.reshape(N, n_out)


def fold_bn_into_conv(w_oihw, gamma, beta, mean, var, eps=1e-5):
    """Eval-mode BN folded into a bias-free conv: w' = w*scale, b = beta-scale*mu."""
    scale = gamma / jnp.sqrt(var + eps)
    return w_oihw * scale[:, None, None, None], beta - scale * mean


# ----------------------------------------------------------------------------
# Pure-JAX reference (lax.conv based) for correctness checking
# ----------------------------------------------------------------------------
def ref_forward(x, wf_stem, b_stem, wf_blk, b_blk, wf_head, b_head, fc_w, fc_b):
    dn = ('NCHW', 'OIHW', 'NCHW')
    bf = jnp.bfloat16

    def conv(v, w, stride, pad):
        return jax.lax.conv_general_dilated(
            v.astype(bf), w.astype(bf), (stride, stride),
            ((pad, pad), (pad, pad)), dimension_numbers=dn,
            preferred_element_type=jnp.float32)

    stem = _silu(conv(x, wf_stem, 2, 1) + b_stem[None, :, None, None])
    blk = stem + _silu(conv(stem, wf_blk, 1, 1) + b_blk[None, :, None, None])
    head = _silu(conv(blk, wf_head, 1, 0) + b_head[None, :, None, None])
    pooled = jnp.mean(head, axis=(2, 3))
    return pooled @ fc_w + fc_b[None, :]


if __name__ == "__main__":
    N, H, W = 2, 32, 32
    C_STEM, C_HEAD, N_OUT = 32, 128, 2

    key = jax.random.PRNGKey(0)
    ks = jax.random.split(key, 9)

    x = jax.random.normal(ks[0], (N, 1, H, W), jnp.float32)     # 1-channel input

    def bn_params(k, c):
        k1, k2, k3, k4 = jax.random.split(k, 4)
        return (1.0 + 0.1 * jax.random.normal(k1, (c,), jnp.float32),
                0.1 * jax.random.normal(k2, (c,), jnp.float32),
                0.1 * jax.random.normal(k3, (c,), jnp.float32),
                1.0 + 0.1 * jax.random.uniform(k4, (c,), jnp.float32))

    w_stem = 0.30 * jax.random.normal(ks[1], (C_STEM, 1, 3, 3), jnp.float32)
    w_blk = 0.033 * jax.random.normal(ks[2], (C_STEM, C_STEM, 3, 3), jnp.float32)
    w_head = 0.15 * jax.random.normal(ks[3], (C_HEAD, C_STEM, 1, 1), jnp.float32)
    fc_w = 0.05 * jax.random.normal(ks[4], (C_HEAD, N_OUT), jnp.float32)
    fc_b = 0.05 * jax.random.normal(ks[5], (N_OUT,), jnp.float32)

    wf_stem, b_stem = fold_bn_into_conv(w_stem, *bn_params(ks[6], C_STEM))
    wf_blk, b_blk = fold_bn_into_conv(w_blk, *bn_params(ks[7], C_STEM))
    wf_head, b_head = fold_bn_into_conv(w_head, *bn_params(ks[8], C_HEAD))

    params = dict(
        stem_w=wf_stem.reshape(C_STEM, 9).astype(jnp.bfloat16),
        stem_b=b_stem.reshape(C_STEM, 1),
        # (Cout, Cin, 3, 3) -> (Cout, 9*Cin) with column (dh*3+dw)*Cin + c,
        # matching the in-kernel tap_buf row layout (tap t rows t*Cin..+Cin).
        blk_w=wf_blk.transpose(0, 2, 3, 1).reshape(C_STEM, 9 * C_STEM)
                    .astype(jnp.bfloat16),
        blk_b=b_blk.reshape(C_STEM, 1),
        head_w=wf_head.reshape(C_HEAD, C_STEM).astype(jnp.bfloat16),
        head_b=b_head.reshape(C_HEAD, 1),
        fc_w=fc_w,
        fc_b=fc_b.reshape(1, N_OUT),
    )

    out = jax.jit(focus_regressor_forward)(x, params)
    out = jax.block_until_ready(out)
    assert out.shape == (N, N_OUT), out.shape

    ref = ref_forward(x, wf_stem, b_stem, wf_blk, b_blk, wf_head, b_head,
                      fc_w, fc_b)
    max_err = float(jnp.max(jnp.abs(out - ref)))
    assert jnp.allclose(out, ref, atol=2e-2, rtol=2e-2), max_err

    print("KERNEL_OK")
</pallas_src>

<mosaic_0001>
module attributes {stable_mosaic.version = 11 : i64} {
  func.func @_fused_kernel(%arg0: i32, %arg1: memref<1x9x256xf32, #tpu.memory_space<vmem>>, %arg2: memref<9x1x256xbf16, #tpu.memory_space<vmem>>, %arg3: memref<32x9xbf16, #tpu.memory_space<vmem>>, %arg4: memref<32x1xf32, #tpu.memory_space<vmem>>, %arg5: memref<32x288xbf16, #tpu.memory_space<vmem>>, %arg6: memref<32x1xf32, #tpu.memory_space<vmem>>, %arg7: memref<128x32xbf16, #tpu.memory_space<vmem>>, %arg8: memref<128x1xf32, #tpu.memory_space<vmem>>, %arg9: memref<128x2xf32, #tpu.memory_space<vmem>>, %arg10: memref<1x2xf32, #tpu.memory_space<vmem>>, %arg11: memref<1x1x2xf32, #tpu.memory_space<vmem>>, %arg12: memref<288x256xbf16, #tpu.memory_space<vmem>>) attributes {dimension_semantics = [#tpu.dimension_semantics<parallel>], iteration_bounds = array<i64: 2>, scalar_prefetch = 0 : i64, scratch_operands = 1 : i64, tpu.core_type = #tpu.core_type<tc>, window_params = [{transform_indices = @transform_0, window_bounds = array<i64: 1, 9, 256>}, {pipeline_mode = #tpu.pipeline_mode<synchronous>, transform_indices = @transform_1, window_bounds = array<i64: 9, 1, 256>}, {pipeline_mode = #tpu.pipeline_mode<synchronous>, transform_indices = @transform_2, window_bounds = array<i64: 32, 9>}, {pipeline_mode = #tpu.pipeline_mode<synchronous>, transform_indices = @transform_3, window_bounds = array<i64: 32, 1>}, {pipeline_mode = #tpu.pipeline_mode<synchronous>, transform_indices = @transform_4, window_bounds = array<i64: 32, 288>}, {pipeline_mode = #tpu.pipeline_mode<synchronous>, transform_indices = @transform_5, window_bounds = array<i64: 32, 1>}, {pipeline_mode = #tpu.pipeline_mode<synchronous>, transform_indices = @transform_6, window_bounds = array<i64: 128, 32>}, {pipeline_mode = #tpu.pipeline_mode<synchronous>, transform_indices = @transform_7, window_bounds = array<i64: 128, 1>}, {pipeline_mode = #tpu.pipeline_mode<synchronous>, transform_indices = @transform_8, window_bounds = array<i64: 128, 2>}, {pipeline_mode = #tpu.pipeline_mode<synchronous>, transform_indices = @transform_9, window_bounds = array<i64: 1, 2>}, {transform_indices = @transform_10, window_bounds = array<i64: 1, 1, 2>}]} {
    %c0 = arith.constant 0 : index
    %c0_0 = arith.constant 0 : index
    %c0_1 = arith.constant 0 : index
    %0 = vector.load %arg1[%c0, %c0_0, %c0_1] : memref<1x9x256xf32, #tpu.memory_space<vmem>>, vector<1x9x256xf32>
    %1 = vector.shape_cast %0 : vector<1x9x256xf32> to vector<9x256xf32>
    %2 = arith.truncf %1 : vector<9x256xf32> to vector<9x256xbf16>
    %c0_2 = arith.constant 0 : index
    %c0_3 = arith.constant 0 : index
    %3 = vector.load %arg3[%c0_2, %c0_3] : memref<32x9xbf16, #tpu.memory_space<vmem>>, vector<32x9xbf16>
    %cst = arith.constant dense<0.000000e+00> : vector<32x256xf32>
    %4 = tpu.matmul %3, %2, %cst {dimension_numbers = #tpu.dot_dimension_numbers<[1], [0], [0], [1], [0, 0, 1, 1], [], []>} : vector<32x9xbf16>, vector<9x256xbf16>, vector<32x256xf32> -> vector<32x256xf32>
    %c0_4 = arith.constant 0 : index
    %c0_5 = arith.constant 0 : index
    %5 = vector.load %arg4[%c0_4, %c0_5] : memref<32x1xf32, #tpu.memory_space<vmem>>, vector<32x1xf32>
    %6 = vector.broadcast %5 : vector<32x1xf32> to vector<32x256xf32>
    %7 = arith.addf %4, %6 : vector<32x256xf32>
    %cst_6 = arith.constant 0.000000e+00 : f32
    %8 = vector.broadcast %cst_6 : f32 to vector<32x256xf32>
    %9 = arith.subf %8, %7 : vector<32x256xf32>
    %10 = math.exp %9 : vector<32x256xf32>
    %cst_7 = arith.constant 1.000000e+00 : f32
    %11 = vector.broadcast %cst_7 : f32 to vector<32x256xf32>
    %12 = arith.addf %11, %10 : vector<32x256xf32>
    %cst_8 = arith.constant 1.000000e+00 : f32
    %13 = vector.broadcast %cst_8 : f32 to vector<32x256xf32>
    %14 = arith.divf %13, %12 : vector<32x256xf32>
    %15 = arith.mulf %7, %14 : vector<32x256xf32>
    %c0_9 = arith.constant 0 : index
    %c0_10 = arith.constant 0 : index
    %c0_11 = arith.constant 0 : index
    %16 = vector.load %arg2[%c0_9, %c0_10, %c0_11] : memref<9x1x256xbf16, #tpu.memory_space<vmem>>, vector<9x1x256xbf16>
    %c17_i32 = arith.constant 17 : i32
    %17 = tpu.dynamic_rotate %15 by %c17_i32 dim 1 : vector<32x256xf32>, i32 -> vector<32x256xf32>
    %18 = arith.truncf %17 : vector<32x256xf32> to vector<32x256xbf16>
    %19 = vector.extract_strided_slice %16 {offsets = [0, 0, 0], sizes = [1, 1, 256], strides = [1, 1, 1]} : vector<9x1x256xbf16> to vector<1x1x256xbf16>
    %20 = vector.shape_cast %19 : vector<1x1x256xbf16> to vector<1x256xbf16>
    %21 = vector.broadcast %20 : vector<1x256xbf16> to vector<32x256xbf16>
    %22 = arith.mulf %18, %21 : vector<32x256xbf16>
    %c0_12 = arith.constant 0 : index
    %c0_13 = arith.constant 0 : index
    %23 = vector.load %arg12[%c0_12, %c0_13] : memref<288x256xbf16, #tpu.memory_space<vmem>>, vector<32x256xbf16>
    tpu.vector_store %arg12[%c0_12, %c0_13], %22 {strides = array<i32>} : memref<288x256xbf16, #tpu.memory_space<vmem>>, vector<32x256xbf16>,
    %c16_i32 = arith.constant 16 : i32
    %24 = tpu.dynamic_rotate %15 by %c16_i32 dim 1 : vector<32x256xf32>, i32 -> vector<32x256xf32>
    %25 = arith.truncf %24 : vector<32x256xf32> to vector<32x256xbf16>
    %26 = vector.extract_strided_slice %16 {offsets = [1, 0, 0], sizes = [1, 1, 256], strides = [1, 1, 1]} : vector<9x1x256xbf16> to vector<1x1x256xbf16>
    %27 = vector.shape_cast %26 : vector<1x1x256xbf16> to vector<1x256xbf16>
    %28 = vector.broadcast %27 : vector<1x256xbf16> to vector<32x256xbf16>
    %29 = arith.mulf %25, %28 : vector<32x256xbf16>
    %c32 = arith.constant 32 : index
    %c0_14 = arith.constant 0 : index
    %30 = vector.load %arg12[%c32, %c0_14] : memref<288x256xbf16, #tpu.memory_space<vmem>>, vector<32x256xbf16>
    tpu.vector_store %arg12[%c32, %c0_14], %29 {strides = array<i32>} : memref<288x256xbf16, #tpu.memory_space<vmem>>, vector<32x256xbf16>,
    %c15_i32 = arith.constant 15 : i32
    %31 = tpu.dynamic_rotate %15 by %c15_i32 dim 1 : vector<32x256xf32>, i32 -> vector<32x256xf32>
    %32 = arith.truncf %31 : vector<32x256xf32> to vector<32x256xbf16>
    %33 = vector.extract_strided_slice %16 {offsets = [2, 0, 0], sizes = [1, 1, 256], strides = [1, 1, 1]} : vector<9x1x256xbf16> to vector<1x1x256xbf16>
    %34 = vector.shape_cast %33 : vector<1x1x256xbf16> to vector<1x256xbf16>
    %35 = vector.broadcast %34 : vector<1x256xbf16> to vector<32x256xbf16>
    %36 = arith.mulf %32, %35 : vector<32x256xbf16>
    %c64 = arith.constant 64 : index
    %c0_15 = arith.constant 0 : index
    %37 = vector.load %arg12[%c64, %c0_15] : memref<288x256xbf16, #tpu.memory_space<vmem>>, vector<32x256xbf16>
    tpu.vector_store %arg12[%c64, %c0_15], %36 {strides = array<i32>} : memref<288x256xbf16, #tpu.memory_space<vmem>>, vector<32x256xbf16>,
    %c1_i32 = arith.constant 1 : i32
    %38 = tpu.dynamic_rotate %15 by %c1_i32 dim 1 : vector<32x256xf32>, i32 -> vector<32x256xf32>
    %39 = arith.truncf %38 : vector<32x256xf32> to vector<32x256xbf16>
    %40 = vector.extract_strided_slice %16 {offsets = [3, 0, 0], sizes = [1, 1, 256], strides = [1, 1, 1]} : vector<9x1x256xbf16> to vector<1x1x256xbf16>
    %41 = vector.shape_cast %40 : vector<1x1x256xbf16> to vector<1x256xbf16>
    %42 = vector.broadcast %41 : vector<1x256xbf16> to vector<32x256xbf16>
    %43 = arith.mulf %39, %42 : vector<32x256xbf16>
    %c96 = arith.constant 96 : index
    %c0_16 = arith.constant 0 : index
    %44 = vector.load %arg12[%c96, %c0_16] : memref<288x256xbf16, #tpu.memory_space<vmem>>, vector<32x256xbf16>
    tpu.vector_store %arg12[%c96, %c0_16], %43 {strides = array<i32>} : memref<288x256xbf16, #tpu.memory_space<vmem>>, vector<32x256xbf16>,
    %45 = arith.truncf %15 : vector<32x256xf32> to vector<32x256xbf16>
    %46 = vector.extract_strided_slice %16 {offsets = [4, 0, 0], sizes = [1, 1, 256], strides = [1, 1, 1]} : vector<9x1x256xbf16> to vector<1x1x256xbf16>
    %47 = vector.shape_cast %46 : vector<1x1x256xbf16> to vector<1x256xbf16>
    %48 = vector.broadcast %47 : vector<1x256xbf16> to vector<32x256xbf16>
    %49 = arith.mulf %45, %48 : vector<32x256xbf16>
    %c128 = arith.constant 128 : index
    %c0_17 = arith.constant 0 : index
    %50 = vector.load %arg12[%c128, %c0_17] : memref<288x256xbf16, #tpu.memory_space<vmem>>, vector<32x256xbf16>
    tpu.vector_store %arg12[%c128, %c0_17], %49 {strides = array<i32>} : memref<288x256xbf16, #tpu.memory_space<vmem>>, vector<32x256xbf16>,
    %c255_i32 = arith.constant 255 : i32
    %51 = tpu.dynamic_rotate %15 by %c255_i32 dim 1 : vector<32x256xf32>, i32 -> vector<32x256xf32>
    %52 = arith.truncf %51 : vector<32x256xf32> to vector<32x256xbf16>
    %53 = vector.extract_strided_slice %16 {offsets = [5, 0, 0], sizes = [1, 1, 256], strides = [1, 1, 1]} : vector<9x1x256xbf16> to vector<1x1x256xbf16>
    %54 = vector.shape_cast %53 : vector<1x1x256xbf16> to vector<1x256xbf16>
    %55 = vector.broadcast %54 : vector<1x256xbf16> to vector<32x256xbf16>
    %56 = arith.mulf %52, %55 : vector<32x256xbf16>
    %c160 = arith.constant 160 : index
    %c0_18 = arith.constant 0 : index
    %57 = vector.load %arg12[%c160, %c0_18] : memref<288x256xbf16, #tpu.memory_space<vmem>>, vector<32x256xbf16>
    tpu.vector_store %arg12[%c160, %c0_18], %56 {strides = array<i32>} : memref<288x256xbf16, #tpu.memory_space<vmem>>, vector<32x256xbf16>,
    %c241_i32 = arith.constant 241 : i32
    %58 = tpu.dynamic_rotate %15 by %c241_i32 dim 1 : vector<32x256xf32>, i32 -> vector<32x256xf32>
    %59 = arith.truncf %58 : vector<32x256xf32> to vector<32x256xbf16>
    %60 = vector.extract_strided_slice %16 {offsets = [6, 0, 0], sizes = [1, 1, 256], strides = [1, 1, 1]} : vector<9x1x256xbf16> to vector<1x1x256xbf16>
    %61 = vector.shape_cast %60 : vector<1x1x256xbf16> to vector<1x256xbf16>
    %62 = vector.broadcast %61 : vector<1x256xbf16> to vector<32x256xbf16>
    %63 = arith.mulf %59, %62 : vector<32x256xbf16>
    %c192 = arith.constant 192 : index
    %c0_19 = arith.constant 0 : index
    %64 = vector.load %arg12[%c192, %c0_19] : memref<288x256xbf16, #tpu.memory_space<vmem>>, vector<32x256xbf16>
    tpu.vector_store %arg12[%c192, %c0_19], %63 {strides = array<i32>} : memref<288x256xbf16, #tpu.memory_space<vmem>>, vector<32x256xbf16>,
    %c240_i32 = arith.constant 240 : i32
    %65 = tpu.dynamic_rotate %15 by %c240_i32 dim 1 : vector<32x256xf32>, i32 -> vector<32x256xf32>
    %66 = arith.truncf %65 : vector<32x256xf32> to vector<32x256xbf16>
    %67 = vector.extract_strided_slice %16 {offsets = [7, 0, 0], sizes = [1, 1, 256], strides = [1, 1, 1]} : vector<9x1x256xbf16> to vector<1x1x256xbf16>
    %68 = vector.shape_cast %67 : vector<1x1x256xbf16> to vector<1x256xbf16>
    %69 = vector.broadcast %68 : vector<1x256xbf16> to vector<32x256xbf16>
    %70 = arith.mulf %66, %69 : vector<32x256xbf16>
    %c224 = arith.constant 224 : index
    %c0_20 = arith.constant 0 : index
    %71 = vector.load %arg12[%c224, %c0_20] : memref<288x256xbf16, #tpu.memory_space<vmem>>, vector<32x256xbf16>
    tpu.vector_store %arg12[%c224, %c0_20], %70 {strides = array<i32>} : memref<288x256xbf16, #tpu.memory_space<vmem>>, vector<32x256xbf16>,
    %c239_i32 = arith.constant 239 : i32
    %72 = tpu.dynamic_rotate %15 by %c239_i32 dim 1 : vector<32x256xf32>, i32 -> vector<32x256xf32>
    %73 = arith.truncf %72 : vector<32x256xf32> to vector<32x256xbf16>
    %74 = vector.extract_strided_slice %16 {offsets = [8, 0, 0], sizes = [1, 1, 256], strides = [1, 1, 1]} : vector<9x1x256xbf16> to vector<1x1x256xbf16>
    %75 = vector.shape_cast %74 : vector<1x1x256xbf16> to vector<1x256xbf16>
    %76 = vector.broadcast %75 : vector<1x256xbf16> to vector<32x256xbf16>
    %77 = arith.mulf %73, %76 : vector<32x256xbf16>
    %c256 = arith.constant 256 : index
    %c0_21 = arith.constant 0 : index
    %78 = vector.load %arg12[%c256, %c0_21] : memref<288x256xbf16, #tpu.memory_space<vmem>>, vector<32x256xbf16>
    tpu.vector_store %arg12[%c256, %c0_21], %77 {strides = array<i32>} : memref<288x256xbf16, #tpu.memory_space<vmem>>, vector<32x256xbf16>,
    %c0_22 = arith.constant 0 : index
    %c0_23 = arith.constant 0 : index
    %79 = vector.load %arg5[%c0_22, %c0_23] : memref<32x288xbf16, #tpu.memory_space<vmem>>, vector<32x288xbf16>
    %c0_24 = arith.constant 0 : index
    %c0_25 = arith.constant 0 : index
    %80 = vector.load %arg12[%c0_24, %c0_25] : memref<288x256xbf16, #tpu.memory_space<vmem>>, vector<288x256xbf16>
    %cst_26 = arith.constant dense<0.000000e+00> : vector<32x256xf32>
    %81 = tpu.matmul %79, %80, %cst_26 {dimension_numbers = #tpu.dot_dimension_numbers<[1], [0], [0], [1], [0, 0, 1, 1], [], []>} : vector<32x288xbf16>, vector<288x256xbf16>, vector<32x256xf32> -> vector<32x256xf32>
    %c0_27 = arith.constant 0 : index
    %c0_28 = arith.constant 0 : index
    %82 = vector.load %arg6[%c0_27, %c0_28] : memref<32x1xf32, #tpu.memory_space<vmem>>, vector<32x1xf32>
    %83 = vector.broadcast %82 : vector<32x1xf32> to vector<32x256xf32>
    %84 = arith.addf %81, %83 : vector<32x256xf32>
    %cst_29 = arith.constant 0.000000e+00 : f32
    %85 = vector.broadcast %cst_29 : f32 to vector<32x256xf32>
    %86 = arith.subf %85, %84 : vector<32x256xf32>
    %87 = math.exp %86 : vector<32x256xf32>
    %cst_30 = arith.constant 1.000000e+00 : f32
    %88 = vector.broadcast %cst_30 : f32 to vector<32x256xf32>
    %89 = arith.addf %88, %87 : vector<32x256xf32>
    %cst_31 = arith.constant 1.000000e+00 : f32
    %90 = vector.broadcast %cst_31 : f32 to vector<32x256xf32>
    %91 = arith.divf %90, %89 : vector<32x256xf32>
    %92 = arith.mulf %84, %91 : vector<32x256xf32>
    %93 = arith.addf %92, %15 : vector<32x256xf32>
    %c0_32 = arith.constant 0 : index
    %c0_33 = arith.constant 0 : index
    %94 = vector.load %arg7[%c0_32, %c0_33] : memref<128x32xbf16, #tpu.memory_space<vmem>>, vector<128x32xbf16>
    %95 = arith.truncf %93 : vector<32x256xf32> to vector<32x256xbf16>
    %cst_34 = arith.constant dense<0.000000e+00> : vector<128x256xf32>
    %96 = tpu.matmul %94, %95, %cst_34 {dimension_numbers = #tpu.dot_dimension_numbers<[1], [0], [0], [1], [0, 0, 1, 1], [], []>} : vector<128x32xbf16>, vector<32x256xbf16>, vector<128x256xf32> -> vector<128x256xf32>
    %c0_35 = arith.constant 0 : index
    %c0_36 = arith.constant 0 : index
    %97 = vector.load %arg8[%c0_35, %c0_36] : memref<128x1xf32, #tpu.memory_space<vmem>>, vector<128x1xf32>
    %98 = vector.broadcast %97 : vector<128x1xf32> to vector<128x256xf32>
    %99 = arith.addf %96, %98 : vector<128x256xf32>
    %cst_37 = arith.constant 0.000000e+00 : f32
    %100 = vector.broadcast %cst_37 : f32 to vector<128x256xf32>
    %101 = arith.subf %100, %99 : vector<128x256xf32>
    %102 = math.exp %101 : vector<128x256xf32>
    %cst_38 = arith.constant 1.000000e+00 : f32
    %103 = vector.broadcast %cst_38 : f32 to vector<128x256xf32>
    %104 = arith.addf %103, %102 : vector<128x256xf32>
    %cst_39 = arith.constant 1.000000e+00 : f32
    %105 = vector.broadcast %cst_39 : f32 to vector<128x256xf32>
    %106 = arith.divf %105, %104 : vector<128x256xf32>
    %107 = arith.mulf %99, %106 : vector<128x256xf32>
    %cst_40 = arith.constant dense<0.000000e+00> : vector<128xf32>
    %108 = vector.multi_reduction <add>, %107, %cst_40 [1] : vector<128x256xf32> to vector<128xf32>
    %109 = vector.shape_cast %108 : vector<128xf32> to vector<128x1xf32>
    %cst_41 = arith.constant 2.560000e+02 : f32
    %110 = vector.broadcast %cst_41 : f32 to vector<128x1xf32>
    %111 = arith.divf %109, %110 : vector<128x1xf32>
    %c0_42 = arith.constant 0 : index
    %c0_43 = arith.constant 0 : index
    %112 = vector.load %arg9[%c0_42, %c0_43] : memref<128x2xf32, #tpu.memory_space<vmem>>, vector<128x2xf32>
    %113 = vector.broadcast %111 : vector<128x1xf32> to vector<128x2xf32>
    %114 = arith.mulf %112, %113 : vector<128x2xf32>
    %cst_44 = arith.constant dense<0.000000e+00> : vector<2xf32>
    %115 = vector.multi_reduction <add>, %114, %cst_44 [0] : vector<128x2xf32> to vector<2xf32>
    %116 = vector.shape_cast %115 : vector<2xf32> to vector<1x2xf32>
    %c0_45 = arith.constant 0 : index
    %c0_46 = arith.constant 0 : index
    %117 = vector.load %arg10[%c0_45, %c0_46] : memref<1x2xf32, #tpu.memory_space<vmem>>, vector<1x2xf32>
    %118 = arith.addf %116, %117 : vector<1x2xf32>
    %c0_47 = arith.constant 0 : index
    %c0_48 = arith.constant 0 : index
    %c0_49 = arith.constant 0 : index
    %119 = vector.load %arg11[%c0_47, %c0_48, %c0_49] : memref<1x1x2xf32, #tpu.memory_space<vmem>>, vector<1x1x2xf32>
    %120 = vector.shape_cast %119 : vector<1x1x2xf32> to vector<1x2xf32>
    %121 = vector.shape_cast %118 : vector<1x2xf32> to vector<1x1x2xf32>
    tpu.vector_store %arg11[%c0_47, %c0_48, %c0_49], %121 {strides = array<i32>} : memref<1x1x2xf32, #tpu.memory_space<vmem>>, vector<1x1x2xf32>,
    return
  }
  func.func @transform_0(%arg0: i32) -> (i32, i32, i32) {
    %c0_i32 = arith.constant 0 : i32
    %c0_i32_0 = arith.constant 0 : i32
    %c0_i32_1 = arith.constant 0 : i32
    return %arg0, %c0_i32, %c0_i32_0 : i32, i32, i32
  }
  func.func @transform_1(%arg0: i32) -> (i32, i32, i32) {
    %c0_i32 = arith.constant 0 : i32
    %c0_i32_0 = arith.constant 0 : i32
    %c0_i32_1 = arith.constant 0 : i32
    %c0_i32_2 = arith.constant 0 : i32
    return %c0_i32, %c0_i32_0, %c0_i32_1 : i32, i32, i32
  }
  func.func @transform_2(%arg0: i32) -> (i32, i32) {
    %c0_i32 = arith.constant 0 : i32
    %c0_i32_0 = arith.constant 0 : i32
    %c0_i32_1 = arith.constant 0 : i32
    return %c0_i32, %c0_i32_0 : i32, i32
  }
  func.func @transform_3(%arg0: i32) -> (i32, i32) {
    %c0_i32 = arith.constant 0 : i32
    %c0_i32_0 = arith.constant 0 : i32
    %c0_i32_1 = arith.constant 0 : i32
    return %c0_i32, %c0_i32_0 : i32, i32
  }
  func.func @transform_4(%arg0: i32) -> (i32, i32) {
    %c0_i32 = arith.constant 0 : i32
    %c0_i32_0 = arith.constant 0 : i32
    %c0_i32_1 = arith.constant 0 : i32
    return %c0_i32, %c0_i32_0 : i32, i32
  }
  func.func @transform_5(%arg0: i32) -> (i32, i32) {
    %c0_i32 = arith.constant 0 : i32
    %c0_i32_0 = arith.constant 0 : i32
    %c0_i32_1 = arith.constant 0 : i32
    return %c0_i32, %c0_i32_0 : i32, i32
  }
  func.func @transform_6(%arg0: i32) -> (i32, i32) {
    %c0_i32 = arith.constant 0 : i32
    %c0_i32_0 = arith.constant 0 : i32
    %c0_i32_1 = arith.constant 0 : i32
    return %c0_i32, %c0_i32_0 : i32, i32
  }
  func.func @transform_7(%arg0: i32) -> (i32, i32) {
    %c0_i32 = arith.constant 0 : i32
    %c0_i32_0 = arith.constant 0 : i32
    %c0_i32_1 = arith.constant 0 : i32
    return %c0_i32, %c0_i32_0 : i32, i32
  }
  func.func @transform_8(%arg0: i32) -> (i32, i32) {
    %c0_i32 = arith.constant 0 : i32
    %c0_i32_0 = arith.constant 0 : i32
    %c0_i32_1 = arith.constant 0 : i32
    return %c0_i32, %c0_i32_0 : i32, i32
  }
  func.func @transform_9(%arg0: i32) -> (i32, i32) {
    %c0_i32 = arith.constant 0 : i32
    %c0_i32_0 = arith.constant 0 : i32
    %c0_i32_1 = arith.constant 0 : i32
    return %c0_i32, %c0_i32_0 : i32, i32
  }
  func.func @transform_10(%arg0: i32) -> (i32, i32, i32) {
    %c0_i32 = arith.constant 0 : i32
    %c0_i32_0 = arith.constant 0 : i32
    %c0_i32_1 = arith.constant 0 : i32
    return %arg0, %c0_i32, %c0_i32_0 : i32, i32, i32
  }
}

</mosaic_0001>

<bundles_post_ra>
// kernel: focus_regressor_forward.1
= control target key start
LH: loop header
LB: loop body
LE: loop exit
PB: predicated region body
PF: predicated region fallthrough
CT: control target
= control target key end

     0   :  { %15 = vsyncpa [#allocation4], 0  ;;  %s3923_s0 = inlined_call_operand.vmem [shape: f32[2,9,256], index: 0, kind: input, shape index: {}]   ;;  %s3924_s1 = inlined_call_operand.vmem [shape: bf16[9,1,256], index: 1, kind: input, shape index: {}]   ;;  %s3925_s2 = inlined_call_operand.vmem [shape: bf16[32,9], index: 2, kind: input, shape index: {}]   ;;  %s3926_s3 = inlined_call_operand.vmem [shape: f32[32,1], index: 3, kind: input, shape index: {}]   ;;  %s3927_s4 = inlined_call_operand.vmem [shape: bf16[32,288], index: 4, kind: input, shape index: {}]   ;;  %s3928_s5 = inlined_call_operand.vmem [shape: f32[32,1], index: 5, kind: input, shape index: {}]   ;;  %s3929_s6 = inlined_call_operand.vmem [shape: bf16[128,32], index: 6, kind: input, shape index: {}]   ;;  %s3930_s7 = inlined_call_operand.vmem [shape: f32[128,1], index: 7, kind: input, shape index: {}]   ;;  %s3931_s8 = inlined_call_operand.vmem [shape: f32[128,2], index: 8, kind: input, shape index: {}]   ;;  %s3932_s9 = inlined_call_operand.vmem [shape: f32[1,2], index: 9, kind: input, shape index: {}]   ;;  %s3933_s10 = inlined_call_operand.hbm [shape: f32[2,1,2], index: 10, kind: output, shape index: {}]  }
   0x1   :  { %17 = vsyncpa [#allocation4 + $0x1], 0  ;;  %s3209_s13 = smov 0   ;;  %s3211_s14 = smov 0  }
   0x2   :  { %s3213_s15 = smov 0   ;;  %s3215_s16 = smov 0  }
   0x3 LB: > { %3935 = sst [smem:[#allocation6_spill]] %s3136_s15  ;;  %s3230_s17 = sadd.s32 4294967295, %s3140_s16   ;;  %s3140_s16 = sphi %s3215_s16, %s3943_s16   ;;  %s3136_s15 = sphi %s3213_s15, %s3940_s15   ;;  %s3132_s14 = sphi %s3211_s14, %s3942_s14   ;;  %s3128_s13 = sphi %s3209_s13, %s3941_s13  }
   0x4   : > { %s2539_s18 = sadd.s32 4294967294, %s3140_s16   ;;  %s3234_s19 = sadd.s32 1, %s3140_s16  }
   0x5   : > { %s245_s20 = sadd.s32 1, %s3136_s15  ;;  %s242_s21 = ssub.s32 %s3140_s16, %s3234_s19 }
   0x6   : > { %p255_p0 = scmp.ne.s32.totalorder %s3136_s15, %s3132_s14  ;;  %p243_p1 = scmp.eq.s32.totalorder %s242_s21, 0 }
   0x7   : > { %p256_p2 = scmp.eq.s32.totalorder %s3230_s17, 1  ;;  %p261_p3 = scmp.ne.s32.totalorder %s3132_s14, %s3128_s13 }
   0x8   : > { %p262_p4 = scmp.eq.s32.totalorder %s2539_s18, 1  ;;  %p2542_p7 = scmp.ge.s32.totalorder %s3140_s16, 1 }
   0x9   : > { %s3245_s22 = scalar_select %p243_p1, %s3136_s15, %s245_s20  }
   0xa   : > { %p3247_p5 = por %p256_p2, %p255_p0  ;;  %p3251_p6 = por %p262_p4, %p261_p3 }
   0xb   : > { %3936 = sst [smem:[#allocation7_spill]] %s3245_s22  ;;  %p315_p8 = scmp.lt.s32.totalorder %s3140_s16, 3 }
   0xd   : > { %p316_p9 = pnand %p2542_p7, %p315_p8 }
   0xe   : > { %p352_p10 = scmp.lt.s32.totalorder (!%p316_p9), %s3230_s17, 1  ;;  %s3145_s28 = smov (!%p316_p9), 15  }
   0xf   : > { %319 = sbr.rel (%p316_p9) target bundleno = 1193 (0x4a9), region = 60  ;;  %s3146_s29 = smov (!%p316_p9), 16  }
  0x10   : > { %s3148_s11 = smov (!%p316_p9), 112   ;;  %s3149_s12 = smov (!%p316_p9), 113  }
  0x11   : > { %s3150_s18 = smov (!%p316_p9), 127   ;;  %s3151_s20 = smov (!%p316_p9), 111  }
  0x12   : > { %s2654_s27 = sshll.u32 (!%p316_p9), %s3230_s17, 4 }
  0x14   : > { %vm409_vm0 = vcmask 1043456   ;;  %v3142_v0 = vmov 0   ;;  %s353_s25 = scalar_select %p352_p10, %s3230_s17, 1  ;;  %vm410_vm1 = vcmask 1044480   ;;  %v3143_v1 = vmov 65535   ;;  %v368_v3 = vld [vmem:[%s3926_s3] sm:$0xff] }
  0x15   : > { %451 = vmatprep.mubr.bf16.mxu1 %v3142_v0  ;;  %2709 = vset.pattern.permute.xlu1 %v3142_v0  ;;  %v411_v2 = vsel %vm409_vm0, 4294967295, %v3143_v1  ;;  %v369_v4 = vld [vmem:[%s3926_s3 + $0x8] sm:$0xff]  ;;  %v370_v5 = vld [vmem:[%s3926_s3 + $0x10] sm:$0xff]  ;;  %v371_v6 = vld [vmem:[%s3926_s3 + $0x18] sm:$0xff]  ;;  %vm402_vm2 = vcmask 72704   ;;  %vm1638_vm11 = vcmask 261120  }
  0x16   : > { %2708 = vset.pattern.permute.xlu0 %v3142_v0  ;;  %1730 = vmatprep.mubr.bf16.mxu0 %v3142_v0  ;;  %s2657_s30 = sshll.u32 %s353_s25, 5  ;;  %v412_v9 = vsel %vm410_vm1, %v411_v2, 0  ;;  %v2870_v15 = vld [vmem:[%s3925_s2] sm:$0xff]   ;;  %v2871_v17 = vld [vmem:[%s3925_s2 + $0x8] sm:$0xff]   ;;  %vm2429_vm12 = vcmask 15360   ;;  %s350_s25 = sand.u32 1, %s3132_s14  }
  0x17   : > { %374 = vperm.xlu1 %2709, %v368_v3   ;;  %s356_s15 = scalar_lea.vmem %s3923_s0, %s2657_s30  ;;  %384 = vperm.xlu0 %2708, %v370_v5   ;;  %s3147_s30 = smov 17   ;;  %vm2469_vm13 = vcmask 8192  }
  0x18   : > { %v359_v7 = vld [vmem:[%s356_s15 + $0x8] sm:$0xff]  ;;  %v361_v8 = vld [vmem:[%s356_s15 + $0x18] sm:$0x1]  ;;  %v358_v10 = vld [vmem:[%s356_s15] sm:$0xff] }
  0x19   : > { %v363_v11 = vpack.c.bf16 %v361_v8, %v359_v7  ;;  %v360_v12 = vld [vmem:[%s356_s15 + $0x10] sm:$0x1]  ;;  %s3144_s15 = smov 1  }
  0x1a   : > { %v362_v13 = vpack.c.bf16 %v360_v12, %v358_v10 }
  0x1b   : > { %379 = vperm.xlu1 %2709, %v369_v4   ;;  %v417_v14 = vand.u32 %v412_v9, %v363_v11  ;;  %389 = vperm.xlu0 %2708, %v371_v6  }
  0x1c   : > { %v414_v16 = vand.u32 %v412_v9, %v362_v13 }
  0x1d   : > { %433 = vmatprep.subr.bf16.mxu1 %v417_v14 }
  0x1e   : > { %434 = vmatpush1.bf16.msra.mxu1 %v414_v16 }
  0x21   : > { %2547 = vmatmul.mubr.msk.bf16.vlgmr.msra.gmra.mxu1 %vm402_vm2, %v2870_v15 }
  0x22   : > { %461 = vmatprep.mubr.bf16.mxu1 %v3142_v0 }
  0x29   : > { %2548 = vmatmul.mubr.msk.bf16.gmra.mxu1 %vm402_vm2, %v2871_v17 }
  0x92   : > { %v375_v18 = vpop.permute.xlu1 %374  ;;  %v385_v27 = vpop.permute.xlu0 %384 }
  0x96   : > { %v380_v22 = vpop.permute.xlu1 %379  ;;  %v390_v41 = vpop.permute.xlu0 %389 }
  0xe1   : > { %v453_v19 = vpop.f32.mrf.mxu1 }
  0xe2   : > { %v3285_v20 = vadd.f32 %v453_v19, %v375_v18 }
  0xe3   : > { %v455_v21 = vpop.f32.mrf.mxu1 }
  0xe4   : > { %v472_v23 = vsub.f32 0.0, %v3285_v20  ;;  %v3290_v26 = vadd.f32 %v455_v21, %v375_v18 }
  0xe5   : > { %v457_v24 = vpop.f32.mrf.mxu1 }
  0xe6   : > { %v3288_v25 = vadd.f32 %v457_v24, %v380_v22  ;;  %v480_v29 = vmul.f32 1.442695, %v472_v23  ;;  %v473_v36 = vsub.f32 0.0, %v3290_v26 }
  0xe7   : > { %v459_v28 = vpop.f32.mrf.mxu1 }
  0xe8   : > { %v474_v30 = vsub.f32 0.0, %v3288_v25  ;;  %v3293_v31 = vadd.f32 %v459_v28, %v380_v22  ;;  %2888 = vpow2.f32 %v480_v29  ;;  %v482_v46 = vmul.f32 1.442695, %v473_v36  ;;  %v1406_v28 = vld [vmem:[%s3928_s5 + $0x10] sm:$0xff]  ;;  %v1407_v29 = vld [vmem:[%s3928_s5 + $0x18] sm:$0xff]  ;;  %v1839_v36 = vld [vmem:[%s3930_s7 + $0x20] sm:$0xff] }
  0xe9   : > { %v463_v32 = vpop.f32.mrf.mxu1 }
  0xea   : > { %v484_v33 = vmul.f32 1.442695, %v474_v30  ;;  %v475_v34 = vsub.f32 0.0, %v3293_v31  ;;  %v464_v35 = vadd.f32 %v463_v32, %v385_v27  ;;  %v1404_v30 = vld [vmem:[%s3928_s5] sm:$0xff] }
  0xeb   : > { %v465_v37 = vpop.f32.mrf.mxu1  ;;  %v1835_v32 = vld [vmem:[%s3930_s7] sm:$0xff] }
  0xec   : > { %v476_v38 = vsub.f32 0.0, %v464_v35  ;;  %v466_v39 = vadd.f32 %v465_v37, %v385_v27  ;;  %2890 = vpow2.f32 %v484_v33  ;;  %v486_v40 = vmul.f32 1.442695, %v475_v34  ;;  %v1836_v33 = vld [vmem:[%s3930_s7 + $0x8] sm:$0xff]  ;;  %v1837_v34 = vld [vmem:[%s3930_s7 + $0x10] sm:$0xff] }
  0xed   : > { %v467_v42 = vpop.f32.mrf.mxu1  ;;  %v1840_v37 = vld [vmem:[%s3930_s7 + $0x28] sm:$0xff] }
  0xee   : > { %v488_v43 = vmul.f32 1.442695, %v476_v38  ;;  %v477_v44 = vsub.f32 0.0, %v466_v39  ;;  %v468_v45 = vadd.f32 %v467_v42, %v390_v41  ;;  %v1841_v38 = vld [vmem:[%s3930_s7 + $0x30] sm:$0xff] }
  0xef   : > { %v469_v47 = vpop.f32.mrf.mxu1  ;;  %v1845_v42 = vld [vmem:[%s3930_s7 + $0x50] sm:$0xff] }
  0xf0   : > { %2892 = vpow2.f32 %v488_v43  ;;  %v490_v48 = vmul.f32 1.442695, %v477_v44  ;;  %v478_v49 = vsub.f32 0.0, %v468_v45  ;;  %v470_v50 = vadd.f32 %v469_v47, %v390_v41  ;;  %v1844_v41 = vld [vmem:[%s3930_s7 + $0x48] sm:$0xff]  ;;  %v1846_v43 = vld [vmem:[%s3930_s7 + $0x58] sm:$0xff]  ;;  %v1847_v44 = vld [vmem:[%s3930_s7 + $0x60] sm:$0xff] }
  0xf1   : > { %2894 = vpow2.f32 %v486_v40  ;;  %v1843_v40 = vld [vmem:[%s3930_s7 + $0x40] sm:$0xff]  ;;  %v3152_v47 = vmov 1966171168  }
  0xf2   : > { %2896 = vpow2.f32 %v490_v48  ;;  %v492_v51 = vmul.f32 1.442695, %v478_v49  ;;  %v479_v52 = vsub.f32 0.0, %v470_v50  ;;  %v578_v48 = vunpack.c.l.s4 %v3152_v47  ;;  %v1849_v49 = vld [vmem:[%s3930_s7 + $0x70] sm:$0xff] }
  0xf3   : > { %2898 = vpow2.f32 %v482_v46  ;;  %v553_v46 = vlaneseq }
  0xf4   : > { %2900 = vpow2.f32 %v492_v51  ;;  %v494_v53 = vmul.f32 1.442695, %v479_v52  ;;  %v579_v51 = vunpack.c.0.s8 %v578_v48 }
  0xf5   : > { %v2889_v54 = vpop.eup %2888  ;;  %v581_v52 = vshrl.u32 %v553_v46, 7 }
  0xf6   : > { %2902 = vpow2.f32 %v494_v53  ;;  %v496_v56 = vadd.f32 1.0, %v2889_v54  ;;  %v2564_v53 = vld.sshfl [vmem:[%s3924_s1 + $0x6] sm:$0x11 pattern:$0x75316420] }
  0xf7   : > { %v3391_v54 = vsub.s32 %v579_v51, %v581_v52 }
  0xf8   : > { %2904 = vrcp.f32 %v496_v56  ;;  %v858_v56 = vcombine.high %v2564_v53, %v2564_v53 }
  0xf9   : > { %v2891_v55 = vpop.eup %2890 }
  0xfa   : > { %v498_v58 = vadd.f32 1.0, %v2891_v55  ;;  %v2569_v55 = vld.sshfl [vmem:[%s3924_s1 + $0x8] sm:$0x11 pattern:$0x75316420] }
  0xfc   : > { %2906 = vrcp.f32 %v498_v58  ;;  %v934_v58 = vrot.slane %v2569_v55, %v3391_v54 }
  0xfd   : > { %v2893_v57 = vpop.eup %2892 }
  0xfe   : > { %v2895_v59 = vpop.eup %2894  ;;  %v500_v60 = vadd.f32 1.0, %v2893_v57  ;;  %v927_v57 = vcombine.high %v2569_v55, %v2569_v55 }
  0xff   : > { %v2897_v61 = vpop.eup %2896  ;;  %v499_v2 = vadd.f32 1.0, %v2895_v59  ;;  %v872_v59 = vrot.slane %v858_v56, %v3391_v54 }
 0x100   : > { %v2899_v62 = vpop.eup %2898  ;;  %v501_v63 = vadd.f32 1.0, %v2897_v61  ;;  %2908 = vrcp.f32 %v500_v60  ;;  %v865_v60 = vrot.slane %v2564_v53, %v3391_v54  ;;  %v2559_v61 = vld.sshfl [vmem:[%s3924_s1 + $0x4] sm:$0x11 pattern:$0x75316420] }
 0x101   : > { %v2901_v1 = vpop.eup %2900  ;;  %v497_v5 = vadd.f32 1.0, %v2899_v62  ;;  %v3402_v62 = vand.u32 127, %v553_v46 }
 0x102   : > { %v502_v3 = vadd.f32 1.0, %v2901_v1  ;;  %2910 = vrcp.f32 %v501_v63  ;;  %v3404_v63 = vsub.s32 0, %v581_v52  ;;  %v3407_v1 = vrot.slane %v927_v57, %v3391_v54 }
 0x103   : > { %v2903_v4 = vpop.eup %2902  ;;  %vm837_vm3 = vcmp.lt.s32.totalorder %v3402_v62, 1  ;;  %vm743_vm4 = vcmp.lt.s32.totalorder %v3402_v62, 15  ;;  %vm649_vm5 = vcmp.lt.s32.totalorder %v3402_v62, 16  ;;  %vm555_vm6 = vcmp.lt.s32.totalorder %v3402_v62, 17 }
 0x104   : > { %2912 = vrcp.f32 %v502_v3  ;;  %v503_v6 = vadd.f32 1.0, %v2903_v4  ;;  %v881_v4 = vpack.i.b16 %v872_v59, %v872_v59  ;;  %vm1188_vm7 = vcmp.lt.s32.totalorder %v3402_v62, 112 }
 0x105   : > { %2914 = vrcp.f32 %v499_v2  ;;  %v2905_v7 = vpop.eup %2904  ;;  %v943_v2 = vpack.i.b16 %v934_v58, %v934_v58  ;;  %vm1094_vm8 = vcmp.lt.s32.totalorder %v3402_v62, 113  ;;  %vm1000_vm9 = vcmp.lt.s32.totalorder %v3402_v62, 127 }
 0x106   : > { %2916 = vrcp.f32 %v503_v6  ;;  %v3311_v22 = vmul.f32 %v2905_v7, %v3285_v20  ;;  %v764_v6 = vcombine.high %v2559_v61, %v2559_v61  ;;  %vm1282_vm10 = vcmp.lt.s32.totalorder %v3402_v62, 111  ;;  %v2875_v62 = vld [vmem:[%s3927_s4 + $0x8] ss:$12 sps:$4 sm:$0xff]  }
 0x107   : > { %2918 = vrcp.f32 %v497_v5  ;;  %v874_v5 = vpack.i.b16 %v865_v60, %v865_v60 }
 0x109   : > { %v2907_v8 = vpop.eup %2906 }
 0x10a   : > { %v3302_v16 = vmul.f32 %v2907_v8, %v3288_v25  ;;  %v950_v8 = vpack.i.b16 %v3407_v1, %v3407_v1 }
 0x10c   : > { %v2715_v27 = vpack.i.bf16 %v3302_v16, %v3311_v22 }
 0x10d   : > { %v2909_v9 = vpop.eup %2908 }
 0x10e   : > { %v3297_v13 = vmul.f32 %v2909_v9, %v464_v35  ;;  %v1838_v35 = vld [vmem:[%s3930_s7 + $0x18] sm:$0xff]  ;;  %v3413_v9 = vrot.slane %v943_v2, %v3404_v63 }
 0x10f   : > { %v2911_v10 = vpop.eup %2910 }
 0x110   : > { %v3304_v17 = vmul.f32 %v2911_v10, %v466_v39  ;;  %v1842_v39 = vld [vmem:[%s3930_s7 + $0x38] sm:$0xff] }
 0x111   : > { %v2913_v11 = vpop.eup %2912 }
 0x112   : > { %v2915_v12 = vpop.eup %2914  ;;  %v3299_v14 = vmul.f32 %v2913_v11, %v468_v45  ;;  %v1848_v45 = vld [vmem:[%s3930_s7 + $0x68] sm:$0xff] }
 0x113   : > { %v2917_v15 = vpop.eup %2916  ;;  %v3314_v23 = vmul.f32 %v2915_v12, %v3293_v31  ;;  %v1405_v31 = vld [vmem:[%s3928_s5 + $0x8] sm:$0xff] }
 0x114   : > { %v3306_v18 = vmul.f32 %v2917_v15, %v470_v50  ;;  %v2710_v19 = vpack.i.bf16 %v3299_v14, %v3297_v13  ;;  %v2919_v21 = vpop.eup %2918  ;;  %v1850_v50 = vld [vmem:[%s3930_s7 + $0x78] sm:$0xff] }
 0x115   : > { %v3319_v25 = vmul.f32 %v2919_v21, %v3290_v26  ;;  %v2874_v26 = vld [vmem:[%s3927_s4 + $0x4] ss:$12 sps:$4 sm:$0xff]  }
 0x116   : > { %2711 = vrot.lane.b32.xlu0 %v2710_v19, %s3144_s15  ;;  %v2720_v24 = vpack.i.bf16 %v3306_v18, %v3304_v17  ;;  %1677 = vmatprep.mubr.bf16.mxu1 %v2874_v26  ;;  %v771_v26 = vrot.slane %v2559_v61, %v3391_v54 }
 0x117   : > { %v2725_v20 = vpack.i.bf16 %v3314_v23, %v3319_v25 }
 0x118   : > { %2721 = vrot.lane.b32.xlu1 %v2720_v24, %s3144_s15 }
 0x11a   : > { %2716 = vrot.lane.b32.xlu0 %v2715_v27, %s3144_s15 }
 0x11c   : > { %2726 = vrot.lane.b32.xlu1 %v2725_v20, %s3144_s15  ;;  %s351_s15 = scalar_lea.vmem [#allocation3], %s350_s25 }
 0x11e   : > { %2731 = vrot.lane.b32.xlu0 %v2710_v19, %s3145_s28 }
 0x120   : > { %2741 = vrot.lane.b32.xlu1 %v2720_v24, %s3145_s28 }
 0x122   : > { %2736 = vrot.lane.b32.xlu0 %v2715_v27, %s3145_s28 }
 0x124   : > { %2746 = vrot.lane.b32.xlu1 %v2725_v20, %s3145_s28  ;;  %s2484_s28 = sshll.u32 %s351_s15, 4  ;;  %s2485_s28 = int_to_ptr.vmem [resolvable:$true] %s2484_s28 }
 0x126   : > { %2751 = vrot.lane.b32.xlu0 %v2710_v19, %s3146_s29 }
 0x128   : > { %2761 = vrot.lane.b32.xlu1 %v2720_v24, %s3146_s29 }
 0x12a   : > { %2756 = vrot.lane.b32.xlu0 %v2715_v27, %s3146_s29 }
 0x12c   : > { %2766 = vrot.lane.b32.xlu1 %v2725_v20, %s3146_s29 }
 0x12e   : > { %2771 = vrot.lane.b32.xlu0 %v2710_v19, %s3147_s30 }
 0x130   : > { %2781 = vrot.lane.b32.xlu1 %v2720_v24, %s3147_s30 }
 0x132   : > { %2776 = vrot.lane.b32.xlu0 %v2715_v27, %s3147_s30 }
 0x134   : > { %2786 = vrot.lane.b32.xlu1 %v2725_v20, %s3147_s30 }
 0x136   : > { %2791 = vrot.lane.b32.xlu0 %v2710_v19, %s3148_s11 }
 0x138   : > { %2801 = vrot.lane.b32.xlu1 %v2720_v24, %s3148_s11 }
 0x13a   : > { %2796 = vrot.lane.b32.xlu0 %v2715_v27, %s3148_s11 }
 0x13c   : > { %2806 = vrot.lane.b32.xlu1 %v2725_v20, %s3148_s11  ;;  %s2482_s11 = scalar_lea.hbm %s3933_s10, %s2654_s27 }
 0x13e   : > { %2811 = vrot.lane.b32.xlu0 %v2710_v19, %s3149_s12 }
 0x140   : > { %2821 = vrot.lane.b32.xlu1 %v2720_v24, %s3149_s12 }
 0x142   : > { %2816 = vrot.lane.b32.xlu0 %v2715_v27, %s3149_s12 }
 0x144   : > { %2826 = vrot.lane.b32.xlu1 %v2725_v20, %s3149_s12  ;;  %s2472_s12 = scalar_lea.sflag [#allocation4], %s350_s25 }
 0x146   : > { %2831 = vrot.lane.b32.xlu0 %v2710_v19, %s3150_s18 }
 0x148   : > { %2841 = vrot.lane.b32.xlu1 %v2720_v24, %s3150_s18 }
 0x14a   : > { %2836 = vrot.lane.b32.xlu0 %v2715_v27, %s3150_s18 }
 0x14c   : > { %2846 = vrot.lane.b32.xlu1 %v2725_v20, %s3150_s18  ;;  %s3080_s18 = scalar_lea.vmem %s2485_s28, 16 }
 0x14d   : > { %p3081_p11 = scmp.ne.s32.totalorder %s2485_s28, %s3080_s18 }
 0x14e   : > { %2851 = vrot.lane.b32.xlu0 %v2710_v19, %s3151_s20  ;;  %v2554_v19 = vld.sshfl [vmem:[%s3924_s1 + $0x2] sm:$0x11 pattern:$0x75316420] }
 0x14f   : > { %v677_v53 = vrot.slane %v2554_v19, %v3391_v54  ;;  %p3082_p12 = pnand %p3081_p11, %p3247_p5 }
 0x150   : > { %2861 = vrot.lane.b32.xlu1 %v2720_v24, %s3151_s20  ;;  %v886_v24 = vrot.slane %v881_v4, %v3404_v63 }
 0x151   : > { %p3083_p13 = pneg %p3082_p12 }
 0x152   : > { %2856 = vrot.lane.b32.xlu0 %v2715_v27, %s3151_s20  ;;  %v879_v27 = vrot.slane %v874_v5, %v3404_v63 }
 0x154   : > { %2866 = vrot.lane.b32.xlu1 %v2725_v20, %s3151_s20  ;;  %v778_v20 = vrot.slane %v764_v6, %v3391_v54  ;;  %s3153_s20 = smov [#allocation3]  }
 0x155   : > { %s3084_s21 = sshll.u32 %s3153_s20, 4  ;;  %s3085_s21 = int_to_ptr.vmem [resolvable:$false] %s3084_s21 }
 0x156   : > { %1420 = vperm.xlu0 %2708, %v1406_v28   ;;  %s3086_s17 = scalar_lea.vmem %s3085_s21, 32  ;;  %p3087_p0 = scmp.lt.s32.totalorder %s2485_s28, %s3085_s21 }
 0x157   : > { %p3088_p1 = scmp.lt.s32.totalorder %s3086_s17, %s3080_s18 }
 0x158   : > { %1425 = vperm.xlu1 %2709, %v1407_v29  }
 0x159   : > { %p3089_p2 = por %p3088_p1, %p3087_p0 }
 0x15a   : > { %1410 = vperm.xlu0 %2708, %v1404_v30  }
 0x15b   : > { %p3090_p3 = pnand %p3089_p2, %p3083_p13 }
 0x15c   : > { %1415 = vperm.xlu1 %2709, %v1405_v31  }
 0x15e   : > { %1853 = vperm.xlu0 %2708, %v1835_v32  }
 0x160   : > { %1858 = vperm.xlu1 %2709, %v1836_v33  }
 0x162   : > { %1863 = vperm.xlu0 %2708, %v1837_v34  }
 0x164   : > { %1868 = vperm.xlu1 %2709, %v1838_v35   ;;  %v670_v35 = vcombine.high %v2554_v19, %v2554_v19 }
 0x166   : > { %1873 = vperm.xlu0 %2708, %v1839_v36   ;;  %v684_v52 = vrot.slane %v670_v35, %v3391_v54 }
 0x168   : > { %1878 = vperm.xlu1 %2709, %v1840_v37   ;;  %v693_v19 = vpack.i.b16 %v684_v52, %v684_v52 }
 0x16a   : > { %1883 = vperm.xlu0 %2708, %v1841_v38  }
 0x16c   : > { %1888 = vperm.xlu1 %2709, %v1842_v39  }
 0x16e   : > { %1893 = vperm.xlu0 %2708, %v1843_v40  }
 0x170   : > { %1898 = vperm.xlu1 %2709, %v1844_v41  }
 0x172   : > { %1903 = vperm.xlu0 %2708, %v1845_v42  }
 0x174   : > { %1908 = vperm.xlu1 %2709, %v1846_v43   ;;  %v787_v43 = vpack.i.b16 %v778_v20, %v778_v20 }
 0x176   : > { %1913 = vperm.xlu0 %2708, %v1847_v44   ;;  %v780_v44 = vpack.i.b16 %v771_v26, %v771_v26  ;;  %v792_v2 = vrot.slane %v787_v43, %v3404_v63 }
 0x178   : > { %1918 = vperm.xlu1 %2709, %v1848_v45  }
 0x17a   : > { %1923 = vperm.xlu0 %2708, %v1849_v49  }
 0x17c   : > { %1928 = vperm.xlu1 %2709, %v1850_v50  }
 0x188   : > { %v2712_v3 = vpop.permute.xlu0 %2711 }
 0x189   : > { %v2714_v10 = vunpack.i.h.bf16 %v2712_v3  ;;  %v2713_v11 = vunpack.i.l.bf16 %v2712_v3  ;;  %v785_v3 = vrot.slane %v780_v44, %v3404_v63 }
 0x18a   : > { %v2722_v7 = vpop.permute.xlu1 %2721 }
 0x18b   : > { %v2724_v12 = vunpack.i.h.bf16 %v2722_v7  ;;  %v2723_v15 = vunpack.i.l.bf16 %v2722_v7 }
 0x18c   : > { %v2717_v21 = vpop.permute.xlu0 %2716 }
 0x18d   : > { %v840_v28 = vsel %vm837_vm3, %v2713_v11, %v2723_v15  ;;  %v841_v29 = vsel %vm837_vm3, %v2714_v10, %v2724_v12  ;;  %v844_v30 = vsel %vm837_vm3, %v2723_v15, %v2713_v11  ;;  %v845_v31 = vsel %vm837_vm3, %v2724_v12, %v2714_v10  ;;  %v2549_v10 = vld.sshfl [vmem:[%s3924_s1] sm:$0x11 pattern:$0x75316420] }
 0x18e   : > { %v848_v32 = vpack.c.bf16 %v845_v31, %v844_v30  ;;  %v2727_v33 = vpop.permute.xlu1 %2726  ;;  %v849_v34 = vpack.c.bf16 %v841_v29, %v840_v28  ;;  %v2719_v36 = vunpack.i.h.bf16 %v2717_v21  ;;  %v2718_v37 = vunpack.i.l.bf16 %v2717_v21 }
 0x18f   : > { %v2729_v38 = vunpack.i.h.bf16 %v2727_v33  ;;  %v2728_v39 = vunpack.i.l.bf16 %v2727_v33  ;;  %v686_v21 = vpack.i.b16 %v677_v53, %v677_v53  ;;  %v576_v31 = vcombine.high %v2549_v10, %v2549_v10 }
 0x190   : > { %v2732_v40 = vpop.permute.xlu0 %2731  ;;  %v890_v41 = vmul.bf16 %v886_v24, %v849_v34  ;;  %v889_v42 = vmul.bf16 %v879_v27, %v848_v32 }
 0x191   : > { %v838_v45 = vsel %vm837_vm3, %v2718_v37, %v2728_v39  ;;  %v839_v46 = vsel %vm837_vm3, %v2719_v36, %v2729_v38  ;;  %v842_v47 = vsel %vm837_vm3, %v2728_v39, %v2718_v37  ;;  %v843_v48 = vsel %vm837_vm3, %v2729_v38, %v2719_v36 }
 0x192   : > { %v846_v49 = vpack.c.bf16 %v843_v48, %v842_v47  ;;  %1645 = vmatprep.subr.bf16.mxu1 %v890_v41  ;;  %v2742_v50 = vpop.permute.xlu1 %2741  ;;  %v847_v51 = vpack.c.bf16 %v839_v46, %v838_v45  ;;  %v2734_v55 = vunpack.i.h.bf16 %v2732_v40  ;;  %v2733_v56 = vunpack.i.l.bf16 %v2732_v40  ;;  %v2584_v45 = vld.sshfl [vmem:[%s3924_s1 + $0xe] sm:$0x11 pattern:$0x75316420] }
 0x193   : > { %v2744_v57 = vunpack.i.h.bf16 %v2742_v50  ;;  %v2743_v58 = vunpack.i.l.bf16 %v2742_v50  ;;  %1646 = vmatpush1.bf16.msra.mxu1 %v889_v42  ;;  %v698_v39 = vrot.slane %v693_v19, %v3404_v63  ;;  %v691_v40 = vrot.slane %v686_v21, %v3404_v63 }
 0x194   : > { %v2737_v59 = vpop.permute.xlu0 %2736  ;;  %v888_v60 = vmul.bf16 %v886_v24, %v847_v51  ;;  %v887_v61 = vmul.bf16 %v879_v27, %v846_v49  ;;  %v590_v49 = vrot.slane %v576_v31, %v3391_v54  ;;  %v583_v50 = vrot.slane %v2549_v10, %v3391_v54 }
 0x195   : > { %v746_v4 = vsel %vm743_vm4, %v2733_v56, %v2743_v58  ;;  %v747_v5 = vsel %vm743_vm4, %v2734_v55, %v2744_v57  ;;  %v750_v6 = vsel %vm743_vm4, %v2743_v58, %v2733_v56  ;;  %v751_v7 = vsel %vm743_vm4, %v2744_v57, %v2734_v55 }
 0x196   : > { %v754_v11 = vpack.c.bf16 %v751_v7, %v750_v6  ;;  %v2747_v12 = vpop.permute.xlu1 %2746  ;;  %1647 = vmatprep.subr.bf16.mxu1 %v888_v60  ;;  %v755_v15 = vpack.c.bf16 %v747_v5, %v746_v4  ;;  %v2739_v24 = vunpack.i.h.bf16 %v2737_v59  ;;  %v2738_v27 = vunpack.i.l.bf16 %v2737_v59 }
 0x197   : > { %v2749_v20 = vunpack.i.h.bf16 %v2747_v12  ;;  %v2748_v26 = vunpack.i.l.bf16 %v2747_v12  ;;  %1648 = vmatpush1.bf16.msra.mxu1 %v887_v61  ;;  %v1209_v59 = vcombine.high %v2584_v45, %v2584_v45  ;;  %v599_v7 = vpack.i.b16 %v590_v49, %v590_v49 }
 0x198   : > { %v2752_v28 = vpop.permute.xlu0 %2751  ;;  %v796_v29 = vmul.bf16 %v792_v2, %v755_v15  ;;  %v795_v30 = vmul.bf16 %v785_v3, %v754_v11  ;;  %v592_v10 = vpack.i.b16 %v583_v50, %v583_v50 }
 0x199   : > { %v744_v32 = vsel %vm743_vm4, %v2738_v27, %v2748_v26  ;;  %v745_v33 = vsel %vm743_vm4, %v2739_v24, %v2749_v20  ;;  %v748_v34 = vsel %vm743_vm4, %v2748_v26, %v2738_v27  ;;  %v749_v35 = vsel %vm743_vm4, %v2749_v20, %v2739_v24 }
 0x19a   : > { %v752_v36 = vpack.c.bf16 %v749_v35, %v748_v34  ;;  %v2762_v37 = vpop.permute.xlu1 %2761  ;;  %1649 = vmatprep.subr.bf16.mxu1 %v796_v29  ;;  %v753_v38 = vpack.c.bf16 %v745_v33, %v744_v32  ;;  %v2754_v41 = vunpack.i.h.bf16 %v2752_v28  ;;  %v2753_v42 = vunpack.i.l.bf16 %v2752_v28 }
 0x19b   : > { %v2764_v43 = vunpack.i.h.bf16 %v2762_v37  ;;  %v2763_v44 = vunpack.i.l.bf16 %v2762_v37  ;;  %1650 = vmatpush1.bf16.msra.mxu1 %v795_v30  ;;  %v1223_v20 = vrot.slane %v1209_v59, %v3391_v54  ;;  %v1216_v26 = vrot.slane %v2584_v45, %v3391_v54 }
 0x19c   : > { %v2757_v46 = vpop.permute.xlu0 %2756  ;;  %v794_v47 = vmul.bf16 %v792_v2, %v753_v38  ;;  %v793_v48 = vmul.bf16 %v785_v3, %v752_v36  ;;  %v604_v35 = vrot.slane %v599_v7, %v3404_v63  ;;  %v597_v36 = vrot.slane %v592_v10, %v3404_v63 }
 0x19d   : > { %v652_v51 = vsel %vm649_vm5, %v2753_v42, %v2763_v44  ;;  %v653_v52 = vsel %vm649_vm5, %v2754_v41, %v2764_v43  ;;  %v656_v53 = vsel %vm649_vm5, %v2763_v44, %v2753_v42  ;;  %v657_v55 = vsel %vm649_vm5, %v2764_v43, %v2754_v41 }
 0x19e   : > { %v660_v56 = vpack.c.bf16 %v657_v55, %v656_v53  ;;  %v2767_v57 = vpop.permute.xlu1 %2766  ;;  %1651 = vmatprep.subr.bf16.mxu1 %v794_v47  ;;  %v661_v58 = vpack.c.bf16 %v653_v52, %v652_v51  ;;  %v2759_v60 = vunpack.i.h.bf16 %v2757_v46  ;;  %v2758_v61 = vunpack.i.l.bf16 %v2757_v46 }
 0x19f   : > { %v2769_v2 = vunpack.i.h.bf16 %v2767_v57  ;;  %v2768_v3 = vunpack.i.l.bf16 %v2767_v57  ;;  %1652 = vmatpush1.bf16.msra.mxu1 %v793_v48  ;;  %v1232_v45 = vpack.i.b16 %v1223_v20, %v1223_v20  ;;  %v1225_v46 = vpack.i.b16 %v1216_v26, %v1216_v26 }
 0x1a0   : > { %v2772_v4 = vpop.permute.xlu0 %2771  ;;  %v702_v5 = vmul.bf16 %v698_v39, %v661_v58  ;;  %v701_v6 = vmul.bf16 %v691_v40, %v660_v56 }
 0x1a1   : > { %v650_v11 = vsel %vm649_vm5, %v2758_v61, %v2768_v3  ;;  %v651_v12 = vsel %vm649_vm5, %v2759_v60, %v2769_v2  ;;  %v654_v15 = vsel %vm649_vm5, %v2768_v3, %v2758_v61  ;;  %v655_v19 = vsel %vm649_vm5, %v2769_v2, %v2759_v60 }
 0x1a2   : > { %v658_v21 = vpack.c.bf16 %v655_v19, %v654_v15  ;;  %v2782_v24 = vpop.permute.xlu1 %2781  ;;  %1653 = vmatprep.subr.bf16.mxu1 %v702_v5  ;;  %v659_v27 = vpack.c.bf16 %v651_v12, %v650_v11  ;;  %v2774_v28 = vunpack.i.h.bf16 %v2772_v4  ;;  %v2773_v29 = vunpack.i.l.bf16 %v2772_v4  ;;  %v2574_v11 = vld.sshfl [vmem:[%s3924_s1 + $0xa] sm:$0x11 pattern:$0x75316420] }
 0x1a3   : > { %v2784_v30 = vunpack.i.h.bf16 %v2782_v24  ;;  %v2783_v31 = vunpack.i.l.bf16 %v2782_v24  ;;  %1654 = vmatpush1.bf16.msra.mxu1 %v701_v6  ;;  %v1237_v3 = vrot.slane %v1232_v45, %v3404_v63  ;;  %v1230_v4 = vrot.slane %v1225_v46, %v3404_v63 }
 0x1a4   : > { %v2777_v32 = vpop.permute.xlu0 %2776  ;;  %v700_v33 = vmul.bf16 %v698_v39, %v659_v27  ;;  %v699_v34 = vmul.bf16 %v691_v40, %v658_v21  ;;  %v2579_v39 = vld.sshfl [vmem:[%s3924_s1 + $0xc] sm:$0x11 pattern:$0x75316420] }
 0x1a5   : > { %v558_v37 = vsel %vm555_vm6, %v2773_v29, %v2783_v31  ;;  %v559_v38 = vsel %vm555_vm6, %v2774_v28, %v2784_v30  ;;  %v562_v41 = vsel %vm555_vm6, %v2783_v31, %v2773_v29  ;;  %v563_v42 = vsel %vm555_vm6, %v2784_v30, %v2774_v28 }
 0x1a6   : > { %v566_v40 = vpack.c.bf16 %v563_v42, %v562_v41  ;;  %v2787_v43 = vpop.permute.xlu1 %2786  ;;  %1655 = vmatprep.subr.bf16.mxu1 %v700_v33  ;;  %v567_v44 = vpack.c.bf16 %v559_v38, %v558_v37  ;;  %v2779_v47 = vunpack.i.h.bf16 %v2777_v32  ;;  %v2778_v48 = vunpack.i.l.bf16 %v2777_v32 }
 0x1a7   : > { %v2789_v49 = vunpack.i.h.bf16 %v2787_v43  ;;  %v2788_v50 = vunpack.i.l.bf16 %v2787_v43  ;;  %1656 = vmatpush1.bf16.msra.mxu1 %v699_v34  ;;  %v1115_v55 = vcombine.high %v2579_v39, %v2579_v39  ;;  %v1122_v24 = vrot.slane %v2579_v39, %v3391_v54 }
 0x1a8   : > { %v2792_v51 = vpop.permute.xlu0 %2791  ;;  %v608_v52 = vmul.bf16 %v604_v35, %v567_v44  ;;  %v607_v53 = vmul.bf16 %v597_v36, %v566_v40  ;;  %v1021_v32 = vcombine.high %v2574_v11, %v2574_v11 }
 0x1a9   : > { %v556_v56 = vsel %vm555_vm6, %v2778_v48, %v2788_v50  ;;  %v557_v57 = vsel %vm555_vm6, %v2779_v47, %v2789_v49  ;;  %v560_v58 = vsel %vm555_vm6, %v2788_v50, %v2778_v48  ;;  %v561_v59 = vsel %vm555_vm6, %v2789_v49, %v2779_v47 }
 0x1aa   : > { %v564_v60 = vpack.c.bf16 %v561_v59, %v560_v58  ;;  %v2802_v61 = vpop.permute.xlu1 %2801  ;;  %1657 = vmatprep.subr.bf16.mxu1 %v608_v52  ;;  %v565_v2 = vpack.c.bf16 %v557_v57, %v556_v56  ;;  %v2794_v5 = vunpack.i.h.bf16 %v2792_v51  ;;  %v2793_v6 = vunpack.i.l.bf16 %v2792_v51 }
 0x1ab   : > { %v2804_v7 = vunpack.i.h.bf16 %v2802_v61  ;;  %v2803_v10 = vunpack.i.l.bf16 %v2802_v61  ;;  %1658 = vmatpush1.bf16.msra.mxu1 %v607_v53  ;;  %v1129_v21 = vrot.slane %v1115_v55, %v3391_v54  ;;  %v1131_v39 = vpack.i.b16 %v1122_v24, %v1122_v24 }
 0x1ac   : > { %v2797_v12 = vpop.permute.xlu0 %2796  ;;  %v606_v15 = vmul.bf16 %v604_v35, %v565_v2  ;;  %v605_v19 = vmul.bf16 %v597_v36, %v564_v60  ;;  %v1035_v49 = vrot.slane %v1021_v32, %v3391_v54  ;;  %v1028_v50 = vrot.slane %v2574_v11, %v3391_v54 }
 0x1ad   : > { %v1191_v27 = vsel %vm1188_vm7, %v2793_v6, %v2803_v10  ;;  %v1192_v20 = vsel %vm1188_vm7, %v2794_v5, %v2804_v7  ;;  %v1195_v26 = vsel %vm1188_vm7, %v2803_v10, %v2793_v6  ;;  %v1196_v28 = vsel %vm1188_vm7, %v2804_v7, %v2794_v5 }
 0x1ae   : > { %v1199_v29 = vpack.c.bf16 %v1192_v20, %v1191_v27  ;;  %v2807_v30 = vpop.permute.xlu1 %2806  ;;  %1659 = vmatprep.subr.bf16.mxu1 %v606_v15  ;;  %v1200_v31 = vpack.c.bf16 %v1196_v28, %v1195_v26  ;;  %v2799_v33 = vunpack.i.h.bf16 %v2797_v12  ;;  %v2798_v34 = vunpack.i.l.bf16 %v2797_v12 }
 0x1af   : > { %v2809_v35 = vunpack.i.h.bf16 %v2807_v30  ;;  %v2808_v36 = vunpack.i.l.bf16 %v2807_v30  ;;  %1660 = vmatpush1.bf16.msra.mxu1 %v605_v19  ;;  %v1138_v42 = vpack.i.b16 %v1129_v21, %v1129_v21  ;;  %v1136_v60 = vrot.slane %v1131_v39, %v3404_v63 }
 0x1b0   : > { %v2812_v37 = vpop.permute.xlu0 %2811  ;;  %v1241_v38 = vmul.bf16 %v1237_v3, %v1200_v31  ;;  %v1240_v41 = vmul.bf16 %v1230_v4, %v1199_v29  ;;  %v1044_v11 = vpack.i.b16 %v1035_v49, %v1035_v49  ;;  %v1037_v12 = vpack.i.b16 %v1028_v50, %v1028_v50 }
 0x1b1   : > { %v1189_v40 = vsel %vm1188_vm7, %v2798_v34, %v2808_v36  ;;  %v1190_v43 = vsel %vm1188_vm7, %v2799_v33, %v2809_v35  ;;  %v1193_v44 = vsel %vm1188_vm7, %v2808_v36, %v2798_v34  ;;  %v1194_v45 = vsel %vm1188_vm7, %v2809_v35, %v2799_v33 }
 0x1b2   : > { %v1197_v46 = vpack.c.bf16 %v1190_v43, %v1189_v40  ;;  %v2822_v47 = vpop.permute.xlu1 %2821  ;;  %1661 = vmatprep.subr.bf16.mxu1 %v1241_v38  ;;  %v1198_v48 = vpack.c.bf16 %v1194_v45, %v1193_v44  ;;  %v2814_v51 = vunpack.i.h.bf16 %v2812_v37  ;;  %v2813_v52 = vunpack.i.l.bf16 %v2812_v37 }
 0x1b3   : > { %v2824_v53 = vunpack.i.h.bf16 %v2822_v47  ;;  %v2823_v55 = vunpack.i.l.bf16 %v2822_v47  ;;  %1662 = vmatpush2.bf16.msra.mxu1 %v1240_v41  ;;  %v1143_v59 = vrot.slane %v1138_v42, %v3404_v63  ;;  %v1049_v36 = vrot.slane %v1044_v11, %v3404_v63 }
 0x1b4   : > { %v2817_v56 = vpop.permute.xlu0 %2816  ;;  %v1239_v57 = vmul.bf16 %v1237_v3, %v1198_v48  ;;  %v1238_v58 = vmul.bf16 %v1230_v4, %v1197_v46  ;;  %v2589_v3 = vld.sshfl [vmem:[%s3924_s1 + $0x10] sm:$0x11 pattern:$0x75316420]  ;;  %v1042_v37 = vrot.slane %v1037_v12, %v3404_v63  ;;  %v916_v12 = vpack.c.bf16 %v3314_v23, %v3319_v25 }
 0x1b5   : > { %v1097_v61 = vsel %vm1094_vm8, %v2813_v52, %v2823_v55  ;;  %v1098_v2 = vsel %vm1094_vm8, %v2814_v51, %v2824_v53  ;;  %v1101_v5 = vsel %vm1094_vm8, %v2823_v55, %v2813_v52  ;;  %v1102_v6 = vsel %vm1094_vm8, %v2824_v53, %v2814_v51 }
 0x1b6   : > { %v1105_v4 = vpack.c.bf16 %v1098_v2, %v1097_v61  ;;  %v2827_v7 = vpop.permute.xlu1 %2826  ;;  %1663 = vmatprep.subr.bf16.mxu1 %v1239_v57  ;;  %v1106_v10 = vpack.c.bf16 %v1102_v6, %v1101_v5  ;;  %v2819_v15 = vunpack.i.h.bf16 %v2817_v56  ;;  %v2818_v19 = vunpack.i.l.bf16 %v2817_v56 }
 0x1b7   : > { %v2829_v21 = vunpack.i.h.bf16 %v2827_v7  ;;  %v2828_v24 = vunpack.i.l.bf16 %v2827_v7  ;;  %1664 = vmatpush2.bf16.msra.mxu1 %v1238_v58  ;;  %v1303_v28 = vcombine.high %v2589_v3, %v2589_v3  ;;  %v1310_v46 = vrot.slane %v2589_v3, %v3391_v54 }
 0x1b8   : > { %v2832_v27 = vpop.permute.xlu0 %2831  ;;  %v1147_v20 = vmul.bf16 %v1143_v59, %v1106_v10  ;;  %v1146_v26 = vmul.bf16 %v1136_v60, %v1105_v4  ;;  %v918_v55 = vpack.c.bf16 %v3306_v18, %v3304_v17 }
 0x1b9   : > { %v1095_v29 = vsel %vm1094_vm8, %v2818_v19, %v2828_v24  ;;  %v1096_v30 = vsel %vm1094_vm8, %v2819_v15, %v2829_v21  ;;  %v1099_v31 = vsel %vm1094_vm8, %v2828_v24, %v2818_v19  ;;  %v1100_v32 = vsel %vm1094_vm8, %v2829_v21, %v2819_v15 }
 0x1ba   : > { %v1103_v33 = vpack.c.bf16 %v1096_v30, %v1095_v29  ;;  %v2842_v34 = vpop.permute.xlu1 %2841  ;;  %1665 = vmatprep.subr.bf16.mxu1 %v1147_v20  ;;  %v1104_v35 = vpack.c.bf16 %v1100_v32, %v1099_v31  ;;  %v2834_v38 = vunpack.i.h.bf16 %v2832_v27  ;;  %v2833_v41 = vunpack.i.l.bf16 %v2832_v27 }
 0x1bb   : > { %v2844_v42 = vunpack.i.h.bf16 %v2842_v34  ;;  %v2843_v39 = vunpack.i.l.bf16 %v2842_v34  ;;  %1666 = vmatpush2.bf16.msra.mxu1 %v1146_v26  ;;  %v1317_v45 = vrot.slane %v1303_v28, %v3391_v54  ;;  %v955_v54 = vrot.slane %v950_v8, %v3404_v63 }
 0x1bc   : > { %v2837_v40 = vpop.permute.xlu0 %2836  ;;  %v1145_v43 = vmul.bf16 %v1143_v59, %v1104_v35  ;;  %v1144_v44 = vmul.bf16 %v1136_v60, %v1103_v33  ;;  %v1319_v6 = vpack.i.b16 %v1310_v46, %v1310_v46  ;;  %v917_v29 = vpack.c.bf16 %v3299_v14, %v3297_v13 }
 0x1bd   : > { %v1003_v47 = vsel %vm1000_vm9, %v2833_v41, %v2843_v39  ;;  %v1004_v48 = vsel %vm1000_vm9, %v2834_v38, %v2844_v42  ;;  %v1007_v49 = vsel %vm1000_vm9, %v2843_v39, %v2833_v41  ;;  %v1008_v50 = vsel %vm1000_vm9, %v2844_v42, %v2834_v38 }
 0x1be   : > { %v1011_v51 = vpack.c.bf16 %v1004_v48, %v1003_v47  ;;  %v2847_v52 = vpop.permute.xlu1 %2846  ;;  %1667 = vmatprep.subr.bf16.mxu1 %v1145_v43  ;;  %v1012_v53 = vpack.c.bf16 %v1008_v50, %v1007_v49  ;;  %v2839_v56 = vunpack.i.h.bf16 %v2837_v40  ;;  %v2838_v57 = vunpack.i.l.bf16 %v2837_v40 }
 0x1bf   : > { %v2849_v58 = vunpack.i.h.bf16 %v2847_v52  ;;  %v2848_v59 = vunpack.i.l.bf16 %v2847_v52  ;;  %1668 = vmatpush2.bf16.msra.mxu1 %v1144_v44  ;;  %v1326_v5 = vpack.i.b16 %v1317_v45, %v1317_v45  ;;  %v959_v30 = vmul.bf16 %v955_v54, %v918_v55 }
 0x1c0   : > { %v2852_v60 = vpop.permute.xlu0 %2851  ;;  %v1053_v61 = vmul.bf16 %v1049_v36, %v1012_v53  ;;  %v1052_v2 = vmul.bf16 %v1042_v37, %v1011_v51  ;;  %v1324_v33 = vrot.slane %v1319_v6, %v3404_v63  ;;  %v958_v44 = vmul.bf16 %v3413_v9, %v917_v29 }
 0x1c1   : > { %v1001_v3 = vsel %vm1000_vm9, %v2838_v57, %v2848_v59  ;;  %v1002_v4 = vsel %vm1000_vm9, %v2839_v56, %v2849_v58  ;;  %v1005_v1 = vsel %vm1000_vm9, %v2848_v59, %v2838_v57  ;;  %v1006_v8 = vsel %vm1000_vm9, %v2849_v58, %v2839_v56  ;;  %v2872_v57 = vld [vmem:[%s3927_s4] ss:$12 sps:$4 sm:$0xff]  }
 0x1c2   : > { %v1009_v7 = vpack.c.bf16 %v1002_v4, %v1001_v3  ;;  %v2862_v10 = vpop.permute.xlu1 %2861  ;;  %1669 = vmatprep.subr.bf16.mxu1 %v1053_v61  ;;  %v1010_v11 = vpack.c.bf16 %v1006_v8, %v1005_v1  ;;  %v2854_v15 = vunpack.i.h.bf16 %v2852_v60  ;;  %v2853_v19 = vunpack.i.l.bf16 %v2852_v60  ;;  %v2879_v58 = vld [vmem:[%s3927_s4 + $0x20] ss:$12 sps:$4 sm:$0xff]  }
 0x1c3   : > { %v2864_v21 = vunpack.i.h.bf16 %v2862_v10  ;;  %v2863_v24 = vunpack.i.l.bf16 %v2862_v10  ;;  %1670 = vmatpush2.bf16.msra.mxu1 %v1052_v2  ;;  %v1331_v28 = vrot.slane %v1326_v5, %v3404_v63  ;;  %v915_v63 = vpack.c.bf16 %v3302_v16, %v3311_v22 }
 0x1c4   : > { %v2857_v27 = vpop.permute.xlu0 %2856  ;;  %v1051_v20 = vmul.bf16 %v1049_v36, %v1010_v11  ;;  %v1050_v26 = vmul.bf16 %v1042_v37, %v1009_v7  ;;  %v957_v50 = vmul.bf16 %v955_v54, %v916_v12  ;;  %v2876_v54 = vld [vmem:[%s3927_s4 + $0x1c] ss:$12 sps:$4 sm:$0xff]  }
 0x1c5   : > { %v1289_v31 = vsel %vm1282_vm10, %v2863_v24, %v2853_v19  ;;  %v1290_v32 = vsel %vm1282_vm10, %v2864_v21, %v2854_v15  ;;  %v2859_v34 = vunpack.i.h.bf16 %v2857_v27  ;;  %v1285_v36 = vsel %vm1282_vm10, %v2853_v19, %v2863_v24 }
 0x1c6   : > { %v2867_v35 = vpop.permute.xlu1 %2866  ;;  %1671 = vmatprep.subr.bf16.mxu1 %v1051_v20  ;;  %v1294_v38 = vpack.c.bf16 %v1290_v32, %v1289_v31  ;;  %v1286_v37 = vsel %vm1282_vm10, %v2854_v15, %v2864_v21  ;;  %v2858_v41 = vunpack.i.l.bf16 %v2857_v27  ;;  %v956_v56 = vmul.bf16 %v3413_v9, %v915_v63  ;;  %v2878_v9 = vld [vmem:[%s3927_s4 + $0x18] ss:$12 sps:$4 sm:$0xff]  }
 0x1c7   : > { %v2869_v42 = vunpack.i.h.bf16 %v2867_v35  ;;  %v2868_v39 = vunpack.i.l.bf16 %v2867_v35  ;;  %1672 = vmatpush2.bf16.msra.mxu1 %v1050_v26  ;;  %v1293_v40 = vpack.c.bf16 %v1286_v37, %v1285_v36 }
 0x1c8   : > { %1673 = vmatprep.subr.bf16.mxu1 %v959_v30  ;;  %v1335_v43 = vmul.bf16 %v1331_v28, %v1294_v38 }
 0x1c9   : > { %v1283_v45 = vsel %vm1282_vm10, %v2858_v41, %v2868_v39  ;;  %v1284_v46 = vsel %vm1282_vm10, %v2859_v34, %v2869_v42  ;;  %v1287_v47 = vsel %vm1282_vm10, %v2868_v39, %v2858_v41  ;;  %v1288_v48 = vsel %vm1282_vm10, %v2869_v42, %v2859_v34 }
 0x1ca   : > { %1710 = vmatprep.subr.bf16.mxu0 %v1335_v43  ;;  %v1334_v49 = vmul.bf16 %v1324_v33, %v1293_v40  ;;  %v1292_v51 = vpack.c.bf16 %v1288_v48, %v1287_v47  ;;  %v1291_v52 = vpack.c.bf16 %v1284_v46, %v1283_v45 }
 0x1cb   : > { %1674 = vmatpush2.bf16.msra.mxu1 %v958_v44 }
 0x1cc   : > { %1711 = vmatpush1.bf16.msra.mxu0 %v1334_v49  ;;  %1675 = vmatprep.subr.bf16.mxu1 %v957_v50  ;;  %v1333_v53 = vmul.bf16 %v1331_v28, %v1292_v51  ;;  %v1332_v55 = vmul.bf16 %v1324_v33, %v1291_v52 }
 0x1ce   : > { %1712 = vmatprep.subr.bf16.mxu0 %v1333_v53 }
 0x1cf   : > { %1676 = vmatpush2.bf16.msra.mxu1 %v956_v56 }
 0x1d0   : > { %1713 = vmatpush1.bf16.msra.mxu0 %v1332_v55 }
 0x1d1   : > { %v1421_v59 = vpop.permute.xlu0 %1420 }
 0x1d2   : > { %1678 = vmatmul.mubr.bf16.vlgmr.msra.gmra.mxu1 %v2872_v57 }
 0x1d3   : > { %2636 = vmatmul.mubr.msk.bf16.vlgmr.msra.gmra.mxu0 %vm1638_vm11, %v2875_v62  ;;  %1687 = vmatprep.mubr.bf16.mxu1 %v2876_v54  ;;  %v1426_v60 = vpop.permute.xlu1 %1425 }
 0x1d4   : > { %1740 = vmatprep.mubr.bf16.mxu0 %v3142_v0 }
 0x1d5   : > { %v1411_v5 = vpop.permute.xlu0 %1410 }
 0x1d7   : > { %v1416_v1 = vpop.permute.xlu1 %1415 }
 0x1da   : > { %1688 = vmatmul.mubr.bf16.gmra.mxu1 %v2878_v9 }
 0x1db   : > { %2637 = vmatmul.mubr.msk.bf16.gmra.mxu0 %vm1638_vm11, %v2879_v58 }
 0x1dc   : > { %2027 = vmatprep.mubr.bf16.mxu0 %v3142_v0 }
 0x292   : > { %v1679_v61 = vpop.f32.mrf.mxu1 }
 0x293   : > { %v1732_v2 = vpop.f32.mrf.mxu0  ;;  %v1680_v8 = vadd.f32 %v1679_v61, %v1411_v5 }
 0x294   : > { %v1681_v6 = vpop.f32.mrf.mxu1 }
 0x295   : > { %v1682_v3 = vadd.f32 %v1681_v6, %v1411_v5  ;;  %v1734_v4 = vpop.f32.mrf.mxu0  ;;  %v3636_v20 = vadd.f32 %v1732_v2, %v1680_v8 }
 0x296   : > { %v1683_v7 = vpop.f32.mrf.mxu1 }
 0x297   : > { %v3631_v10 = vadd.f32 %v1734_v4, %v1682_v3  ;;  %v1684_v11 = vadd.f32 %v1683_v7, %v1416_v1  ;;  %v1736_v12 = vpop.f32.mrf.mxu0  ;;  %v1751_v36 = vsub.f32 0.0, %v3636_v20 }
 0x298   : > { %v1685_v15 = vpop.f32.mrf.mxu1 }
 0x299   : > { %v1752_v19 = vsub.f32 0.0, %v3631_v10  ;;  %v3634_v21 = vadd.f32 %v1736_v12, %v1684_v11  ;;  %v1686_v24 = vadd.f32 %v1685_v15, %v1416_v1  ;;  %v1738_v27 = vpop.f32.mrf.mxu0  ;;  %v1759_v49 = vmul.f32 1.442695, %v1751_v36 }
 0x29a   : > { %v1689_v26 = vpop.f32.mrf.mxu1 }
 0x29b   : > { %v1761_v28 = vmul.f32 1.442695, %v1752_v19  ;;  %v1753_v29 = vsub.f32 0.0, %v3634_v21  ;;  %v3639_v30 = vadd.f32 %v1738_v27, %v1686_v24  ;;  %v1742_v31 = vpop.f32.mrf.mxu0  ;;  %v1690_v32 = vadd.f32 %v1689_v26, %v1421_v59 }
 0x29c   : > { %v1691_v33 = vpop.f32.mrf.mxu1 }
 0x29d   : > { %v1754_v34 = vsub.f32 0.0, %v3639_v30  ;;  %v1692_v35 = vadd.f32 %v1691_v33, %v1421_v59  ;;  %v1744_v38 = vpop.f32.mrf.mxu0  ;;  %2920 = vpow2.f32 %v1761_v28  ;;  %v1743_v37 = vadd.f32 %v1742_v31, %v1690_v32 }
 0x29e   : > { %v1693_v41 = vpop.f32.mrf.mxu1  ;;  %v1763_v42 = vmul.f32 1.442695, %v1753_v29 }
 0x29f   : > { %v1765_v39 = vmul.f32 1.442695, %v1754_v34  ;;  %v1745_v40 = vadd.f32 %v1744_v38, %v1692_v35  ;;  %v1694_v43 = vadd.f32 %v1693_v41, %v1426_v60  ;;  %v1746_v44 = vpop.f32.mrf.mxu0  ;;  %v1755_v63 = vsub.f32 0.0, %v1743_v37 }
 0x2a0   : > { %v1695_v45 = vpop.f32.mrf.mxu1 }
 0x2a1   : > { %2922 = vpow2.f32 %v1765_v39  ;;  %v1756_v46 = vsub.f32 0.0, %v1745_v40  ;;  %v1747_v47 = vadd.f32 %v1746_v44, %v1694_v43  ;;  %v1696_v48 = vadd.f32 %v1695_v45, %v1426_v60  ;;  %v1748_v51 = vpop.f32.mrf.mxu0 }
 0x2a2   : > { %v1767_v50 = vmul.f32 1.442695, %v1755_v63  ;;  %2924 = vpow2.f32 %v1763_v42 }
 0x2a3   : > { %v1769_v52 = vmul.f32 1.442695, %v1756_v46  ;;  %v1757_v53 = vsub.f32 0.0, %v1747_v47  ;;  %v1749_v55 = vadd.f32 %v1748_v51, %v1696_v48  ;;  %v2887_v46 = vld [vmem:[%s3929_s6 + $0x38] sm:$0xff]  }
 0x2a4   : > { %2926 = vpow2.f32 %v1767_v50 }
 0x2a5   : > { %2928 = vpow2.f32 %v1769_v52  ;;  %v1771_v56 = vmul.f32 1.442695, %v1757_v53  ;;  %v1758_v57 = vsub.f32 0.0, %v1749_v55  ;;  %v1859_v53 = vpop.permute.xlu1 %1858 }
 0x2a6   : > { %2930 = vpow2.f32 %v1759_v49 }
 0x2a7   : > { %2932 = vpow2.f32 %v1771_v56  ;;  %v1773_v62 = vmul.f32 1.442695, %v1758_v57 }
 0x2a9   : > { %2934 = vpow2.f32 %v1773_v62 }
 0x2aa   : > { %v2921_v54 = vpop.eup %2920 }
 0x2ab   : > { %v1776_v58 = vadd.f32 1.0, %v2921_v54 }
 0x2ad   : > { %2936 = vrcp.f32 %v1776_v58 }
 0x2ae   : > { %v2923_v9 = vpop.eup %2922 }
 0x2af   : > { %v2925_v59 = vpop.eup %2924  ;;  %v1778_v60 = vadd.f32 1.0, %v2923_v9 }
 0x2b0   : > { %v1777_v1 = vadd.f32 1.0, %v2925_v59 }
 0x2b1   : > { %v2927_v61 = vpop.eup %2926  ;;  %2938 = vrcp.f32 %v1778_v60 }
 0x2b2   : > { %v2929_v2 = vpop.eup %2928  ;;  %v1779_v5 = vadd.f32 1.0, %v2927_v61 }
 0x2b3   : > { %v2931_v6 = vpop.eup %2930  ;;  %v1780_v3 = vadd.f32 1.0, %v2929_v2 }
 0x2b4   : > { %v2933_v4 = vpop.eup %2932  ;;  %v1775_v11 = vadd.f32 1.0, %v2931_v6 }
 0x2b5   : > { %2940 = vrcp.f32 %v1780_v3  ;;  %v1781_v8 = vadd.f32 1.0, %v2933_v4 }
 0x2b6   : > { %v2935_v7 = vpop.eup %2934  ;;  %2942 = vrcp.f32 %v1779_v5 }
 0x2b7   : > { %2944 = vrcp.f32 %v1781_v8  ;;  %v1782_v12 = vadd.f32 1.0, %v2935_v7  ;;  %v1869_v8 = vpop.permute.xlu1 %1868 }
 0x2b8   : > { %2946 = vrcp.f32 %v1777_v1 }
 0x2b9   : > { %2948 = vrcp.f32 %v1782_v12 }
 0x2ba   : > { %2950 = vrcp.f32 %v1775_v11  ;;  %v2937_v15 = vpop.eup %2936 }
 0x2bb   : > { %v1800_v38 = vmul.f32 %v2937_v15, %v3631_v10 }
 0x2be   : > { %v2939_v19 = vpop.eup %2938 }
 0x2bf   : > { %v1802_v29 = vmul.f32 %v2939_v19, %v3639_v30 }
 0x2c1   : > { %v1810_v39 = vadd.f32 %v1802_v29, %v3314_v23 }
 0x2c2   : > { %v2941_v24 = vpop.eup %2940 }
 0x2c3   : > { %v2943_v27 = vpop.eup %2942  ;;  %v1804_v31 = vmul.f32 %v2941_v24, %v1745_v40 }
 0x2c4   : > { %v2945_v26 = vpop.eup %2944  ;;  %v1803_v34 = vmul.f32 %v2943_v27, %v1743_v37  ;;  %v1808_v37 = vadd.f32 %v1800_v38, %v3319_v25  ;;  %v2885_v25 = vld [vmem:[%s3929_s6 + $0x28] sm:$0xff]  }
 0x2c5   : > { %v2947_v28 = vpop.eup %2946  ;;  %v1805_v32 = vmul.f32 %v2945_v26, %v1747_v47  ;;  %v1812_v43 = vadd.f32 %v1804_v31, %v3304_v17  ;;  %v2880_v17 = vld [vmem:[%s3929_s6] sm:$0xff]   ;;  %v1854_v47 = vpop.permute.xlu0 %1853 }
 0x2c6   : > { %v2949_v33 = vpop.eup %2948  ;;  %v1801_v41 = vmul.f32 %v2947_v28, %v3634_v21  ;;  %v1811_v40 = vadd.f32 %v1803_v34, %v3297_v13  ;;  %v1832_v21 = vpack.c.bf16 %v1810_v39, %v1808_v37  ;;  %v2881_v13 = vld [vmem:[%s3929_s6 + $0x8] sm:$0xff]   ;;  %v1879_v39 = vpop.permute.xlu1 %1878 }
 0x2c7   : > { %v2951_v35 = vpop.eup %2950  ;;  %v1806_v36 = vmul.f32 %v2949_v33, %v1749_v55  ;;  %v1813_v42 = vadd.f32 %v1805_v32, %v3299_v14 }
 0x2c8   : > { %v1799_v30 = vmul.f32 %v2951_v35, %v3636_v20  ;;  %v1809_v10 = vadd.f32 %v1801_v41, %v3302_v16  ;;  %v2882_v16 = vld [vmem:[%s3929_s6 + $0x10] sm:$0xff]  }
 0x2c9   : > { %v1814_v44 = vadd.f32 %v1806_v36, %v3306_v18  ;;  %v1833_v45 = vpack.c.bf16 %v1813_v42, %v1811_v40  ;;  %v2883_v18 = vld [vmem:[%s3929_s6 + $0x18] sm:$0xff]   ;;  %v2886_v20 = vld [vmem:[%s3929_s6 + $0x30] sm:$0xff]   ;;  %v1864_v59 = vpop.permute.xlu0 %1863 }
 0x2ca   : > { %v1807_v14 = vadd.f32 %v1799_v30, %v3311_v22  ;;  %v2884_v22 = vld [vmem:[%s3929_s6 + $0x20] sm:$0xff]  }
 0x2cb   : > { %v1834_v63 = vpack.c.bf16 %v1814_v44, %v1812_v43 }
 0x2cc   : > { %v1831_v23 = vpack.c.bf16 %v1809_v10, %v1807_v14 }
 0x2cd   : > { %2007 = vmatprep.subr.bf16.mxu0 %v1834_v63  ;;  %v1874_v28 = vpop.permute.xlu0 %1873 }
 0x2ce   : > { %2008 = vmatpush1.bf16.msra.mxu0 %v1833_v45 }
 0x2cf   : > { %2009 = vmatprep.subr.bf16.mxu0 %v1832_v21 }
 0x2d2   : > { %2010 = vmatpush1.bf16.msra.mxu0 %v1831_v23  ;;  %v1884_v23 = vpop.permute.xlu0 %1883 }
 0x2d5   : > { %2646 = vmatmul.mubr.msk.bf16.vlgmr.msra.gmra.mxu0 %vm1638_vm11, %v2880_v17 }
 0x2d6   : > { %2037 = vmatprep.mubr.bf16.mxu0 %v3142_v0 }
 0x2dd   : > { %2647 = vmatmul.mubr.msk.bf16.gmra.mxu0 %vm1638_vm11, %v2881_v13 }
 0x2de   : > { %2047 = vmatprep.mubr.bf16.mxu0 %v3142_v0 }
 0x2e5   : > { %2648 = vmatmul.mubr.msk.bf16.gmra.mxu0 %vm1638_vm11, %v2882_v16 }
 0x2e6   : > { %2057 = vmatprep.mubr.bf16.mxu0 %v3142_v0 }
 0x2ed   : > { %2649 = vmatmul.mubr.msk.bf16.gmra.mxu0 %vm1638_vm11, %v2883_v18 }
 0x2ee   : > { %2067 = vmatprep.mubr.bf16.mxu0 %v3142_v0 }
 0x2f5   : > { %2650 = vmatmul.mubr.msk.bf16.gmra.mxu0 %vm1638_vm11, %v2884_v22 }
 0x2f6   : > { %2077 = vmatprep.mubr.bf16.mxu0 %v3142_v0 }
 0x2fd   : > { %2651 = vmatmul.mubr.msk.bf16.gmra.mxu0 %vm1638_vm11, %v2885_v25 }
 0x2fe   : > { %2087 = vmatprep.mubr.bf16.mxu0 %v3142_v0 }
 0x305   : > { %2652 = vmatmul.mubr.msk.bf16.gmra.mxu0 %vm1638_vm11, %v2886_v20 }
 0x306   : > { %2097 = vmatprep.mubr.bf16.mxu0 %v3142_v0 }
 0x30d   : > { %2653 = vmatmul.mubr.msk.bf16.gmra.mxu0 %vm1638_vm11, %v2887_v46 }
 0x395   : > { %v2029_v48 = vpop.f32.mrf.mxu0 }
 0x396   : > { %v3694_v49 = vadd.f32 %v2029_v48, %v1854_v47 }
 0x397   : > { %v2031_v50 = vpop.f32.mrf.mxu0 }
 0x398   : > { %v2108_v51 = vsub.f32 0.0, %v3694_v49  ;;  %v3697_v52 = vadd.f32 %v2031_v50, %v1854_v47 }
 0x399   : > { %v2033_v55 = vpop.f32.mrf.mxu0 }
 0x39a   : > { %v2140_v56 = vmul.f32 1.442695, %v2108_v51  ;;  %v2109_v0 = vsub.f32 0.0, %v3697_v52  ;;  %v3700_v57 = vadd.f32 %v2033_v55, %v1859_v53 }
 0x39b   : > { %v2035_v62 = vpop.f32.mrf.mxu0 }
 0x39c   : > { %2952 = vpow2.f32 %v2140_v56  ;;  %v2142_v54 = vmul.f32 1.442695, %v2109_v0  ;;  %v2110_v9 = vsub.f32 0.0, %v3700_v57  ;;  %v3703_v58 = vadd.f32 %v2035_v62, %v1859_v53  ;;  %v1889_v53 = vpop.permute.xlu1 %1888 }
 0x39d   : > { %v2039_v60 = vpop.f32.mrf.mxu0 }
 0x39e   : > { %2954 = vpow2.f32 %v2142_v54  ;;  %v2144_v61 = vmul.f32 1.442695, %v2110_v9  ;;  %v2111_v2 = vsub.f32 0.0, %v3703_v58  ;;  %v3706_v5 = vadd.f32 %v2039_v60, %v1864_v59 }
 0x39f   : > { %v2041_v6 = vpop.f32.mrf.mxu0 }
 0x3a0   : > { %2956 = vpow2.f32 %v2144_v61  ;;  %v2146_v3 = vmul.f32 1.442695, %v2111_v2  ;;  %v2112_v4 = vsub.f32 0.0, %v3706_v5  ;;  %v3709_v1 = vadd.f32 %v2041_v6, %v1864_v59 }
 0x3a1   : > { %v2043_v7 = vpop.f32.mrf.mxu0 }
 0x3a2   : > { %2958 = vpow2.f32 %v2146_v3  ;;  %v2148_v11 = vmul.f32 1.442695, %v2112_v4  ;;  %v2113_v12 = vsub.f32 0.0, %v3709_v1  ;;  %v3712_v15 = vadd.f32 %v2043_v7, %v1869_v8  ;;  %v1894_v7 = vpop.permute.xlu0 %1893 }
 0x3a3   : > { %v2045_v19 = vpop.f32.mrf.mxu0 }
 0x3a4   : > { %2960 = vpow2.f32 %v2148_v11  ;;  %v2150_v24 = vmul.f32 1.442695, %v2113_v12  ;;  %v2114_v27 = vsub.f32 0.0, %v3712_v15  ;;  %v3715_v26 = vadd.f32 %v2045_v19, %v1869_v8 }
 0x3a5   : > { %v2049_v29 = vpop.f32.mrf.mxu0 }
 0x3a6   : > { %2962 = vpow2.f32 %v2150_v24  ;;  %v2152_v31 = vmul.f32 1.442695, %v2114_v27  ;;  %v2115_v32 = vsub.f32 0.0, %v3715_v26  ;;  %v3718_v33 = vadd.f32 %v2049_v29, %v1874_v28 }
 0x3a7   : > { %v2051_v34 = vpop.f32.mrf.mxu0 }
 0x3a8   : > { %2964 = vpow2.f32 %v2152_v31  ;;  %v2154_v35 = vmul.f32 1.442695, %v2115_v32  ;;  %v2116_v38 = vsub.f32 0.0, %v3718_v33  ;;  %v3721_v36 = vadd.f32 %v2051_v34, %v1874_v28 }
 0x3a9   : > { %v2953_v41 = vpop.eup %2952  ;;  %v2053_v42 = vpop.f32.mrf.mxu0 }
 0x3aa   : > { %v2204_v43 = vadd.f32 1.0, %v2953_v41  ;;  %2966 = vpow2.f32 %v2154_v35  ;;  %v2156_v44 = vmul.f32 1.442695, %v2116_v38  ;;  %v2117_v30 = vsub.f32 0.0, %v3721_v36  ;;  %v1899_v35 = vpop.permute.xlu1 %1898 }
 0x3ab   : > { %v2955_v40 = vpop.eup %2954  ;;  %v3724_v37 = vadd.f32 %v2053_v42, %v1879_v39  ;;  %v2055_v63 = vpop.f32.mrf.mxu0 }
 0x3ac   : > { %2968 = vrcp.f32 %v2204_v43  ;;  %v2205_v10 = vadd.f32 1.0, %v2955_v40  ;;  %v2158_v45 = vmul.f32 1.442695, %v2117_v30  ;;  %v3726_v21 = vadd.f32 %v2055_v63, %v1879_v39 }
 0x3ad   : > { %v2957_v14 = vpop.eup %2956  ;;  %2970 = vpow2.f32 %v2156_v44  ;;  %v2118_v17 = vsub.f32 0.0, %v3724_v37  ;;  %v2059_v13 = vpop.f32.mrf.mxu0 }
 0x3ae   : > { %2972 = vrcp.f32 %v2205_v10  ;;  %v2206_v16 = vadd.f32 1.0, %v2957_v14  ;;  %v2119_v18 = vsub.f32 0.0, %v3726_v21  ;;  %v3730_v22 = vadd.f32 %v2059_v13, %v1884_v23 }
 0x3af   : > { %v2959_v25 = vpop.eup %2958  ;;  %2974 = vpow2.f32 %v2158_v45  ;;  %v2160_v20 = vmul.f32 1.442695, %v2118_v17  ;;  %v2061_v46 = vpop.f32.mrf.mxu0 }
 0x3b0   : > { %2976 = vrcp.f32 %v2206_v16  ;;  %v2207_v47 = vadd.f32 1.0, %v2959_v25  ;;  %v2162_v48 = vmul.f32 1.442695, %v2119_v18  ;;  %v2120_v50 = vsub.f32 0.0, %v3730_v22 }
 0x3b1   : > { %v2961_v51 = vpop.eup %2960  ;;  %2978 = vpow2.f32 %v2160_v20  ;;  %v3733_v55 = vadd.f32 %v2061_v46, %v1884_v23  ;;  %v2063_v56 = vpop.f32.mrf.mxu0 }
 0x3b2   : > { %2980 = vrcp.f32 %v2207_v47  ;;  %v2208_v0 = vadd.f32 1.0, %v2961_v51  ;;  %v2164_v62 = vmul.f32 1.442695, %v2120_v50  ;;  %v3735_v54 = vadd.f32 %v2063_v56, %v1889_v53  ;;  %v1904_v46 = vpop.permute.xlu0 %1903 }
 0x3b3   : > { %v2963_v9 = vpop.eup %2962  ;;  %2982 = vpow2.f32 %v2162_v48  ;;  %v2121_v59 = vsub.f32 0.0, %v3733_v55  ;;  %v2065_v60 = vpop.f32.mrf.mxu0 }
 0x3b4   : > { %2984 = vrcp.f32 %v2208_v0  ;;  %v2209_v61 = vadd.f32 1.0, %v2963_v9  ;;  %v2122_v2 = vsub.f32 0.0, %v3735_v54  ;;  %v3739_v6 = vadd.f32 %v2065_v60, %v1889_v53  ;;  %v1909_v60 = vpop.permute.xlu1 %1908 }
 0x3b5   : > { %v2965_v3 = vpop.eup %2964  ;;  %2986 = vpow2.f32 %v2164_v62  ;;  %v2166_v4 = vmul.f32 1.442695, %v2121_v59  ;;  %v2069_v8 = vpop.f32.mrf.mxu0 }
 0x3b6   : > { %2988 = vrcp.f32 %v2209_v61  ;;  %v2210_v11 = vadd.f32 1.0, %v2965_v3  ;;  %v2168_v12 = vmul.f32 1.442695, %v2122_v2  ;;  %v2123_v19 = vsub.f32 0.0, %v3739_v6 }
 0x3b7   : > { %v2967_v24 = vpop.eup %2966  ;;  %2990 = vpow2.f32 %v2166_v4  ;;  %v3742_v27 = vadd.f32 %v2069_v8, %v1894_v7  ;;  %v2071_v28 = vpop.f32.mrf.mxu0 }
 0x3b8   : > { %2992 = vrcp.f32 %v2210_v11  ;;  %v2211_v29 = vadd.f32 1.0, %v2967_v24  ;;  %v2170_v31 = vmul.f32 1.442695, %v2123_v19  ;;  %v3744_v32 = vadd.f32 %v2071_v28, %v1894_v7 }
 0x3b9   : > { %v2969_v34 = vpop.eup %2968  ;;  %2994 = vpow2.f32 %v2168_v12  ;;  %v2124_v38 = vsub.f32 0.0, %v3742_v27  ;;  %v2073_v41 = vpop.f32.mrf.mxu0 }
 0x3ba   : > { %v2971_v42 = vpop.eup %2970  ;;  %2996 = vrcp.f32 %v2211_v29  ;;  %v2125_v39 = vsub.f32 0.0, %v3744_v32  ;;  %v3748_v43 = vadd.f32 %v2073_v41, %v1899_v35  ;;  %v2300_v16 = vmul.f32 %v2969_v34, %v3694_v49 }
 0x3bb   : > { %v2973_v44 = vpop.eup %2972  ;;  %v2212_v30 = vadd.f32 1.0, %v2971_v42  ;;  %2998 = vpow2.f32 %v2170_v31  ;;  %v2172_v40 = vmul.f32 1.442695, %v2124_v38  ;;  %v2075_v63 = vpop.f32.mrf.mxu0 }
 0x3bc   : > { %v2975_v10 = vpop.eup %2974  ;;  %v2301_v45 = vmul.f32 %v2973_v44, %v3697_v52  ;;  %v2174_v14 = vmul.f32 1.442695, %v2125_v39  ;;  %v2126_v23 = vsub.f32 0.0, %v3748_v43  ;;  %v3752_v17 = vadd.f32 %v2075_v63, %v1899_v35  ;;  %v1914_v38 = vpop.permute.xlu0 %1913 }
 0x3bd   : > { %v2977_v13 = vpop.eup %2976  ;;  %3000 = vrcp.f32 %v2212_v30  ;;  %v2213_v18 = vadd.f32 1.0, %v2975_v10  ;;  %v2079_v25 = vpop.f32.mrf.mxu0 }
 0x3be   : > { %v2979_v20 = vpop.eup %2978  ;;  %3002 = vpow2.f32 %v2172_v40  ;;  %v2176_v47 = vmul.f32 1.442695, %v2126_v23  ;;  %v2127_v48 = vsub.f32 0.0, %v3752_v17  ;;  %v3756_v51 = vadd.f32 %v2079_v25, %v1904_v46  ;;  %v1919_v25 = vpop.permute.xlu1 %1918 }
 0x3bf   : > { %v2981_v50 = vpop.eup %2980  ;;  %3004 = vrcp.f32 %v2213_v18  ;;  %v2214_v52 = vadd.f32 1.0, %v2979_v20  ;;  %v2081_v53 = vpop.f32.mrf.mxu0  ;;  %v2332_v56 = vadd.f32 %v2301_v45, %v2300_v16  ;;  %v2302_v61 = vmul.f32 %v2977_v13, %v3700_v57 }
 0x3c0   : > { %v2983_v0 = vpop.eup %2982  ;;  %v2303_v62 = vmul.f32 %v2981_v50, %v3703_v58  ;;  %3006 = vpow2.f32 %v2174_v14  ;;  %v2178_v49 = vmul.f32 1.442695, %v2127_v48  ;;  %v3759_v9 = vadd.f32 %v2081_v53, %v1904_v46 }
 0x3c1   : > { %v2985_v59 = vpop.eup %2984  ;;  %3008 = vrcp.f32 %v2214_v52  ;;  %v2215_v2 = vadd.f32 1.0, %v2983_v0  ;;  %v2128_v3 = vsub.f32 0.0, %v3756_v51  ;;  %2333 = vadd.xlane.f32.xlu0 %v2332_v56  ;;  %v2083_v4 = vpop.f32.mrf.mxu0 }
 0x3c2   : > { %v2987_v8 = vpop.eup %2986  ;;  %3010 = vpow2.f32 %v2176_v47  ;;  %v2129_v7 = vsub.f32 0.0, %v3759_v9  ;;  %v3764_v11 = vadd.f32 %v2083_v4, %v1909_v60  ;;  %v2335_v28 = vadd.f32 %v2303_v62, %v2302_v61 }
 0x3c3   : > { %v2989_v58 = vpop.eup %2988  ;;  %3012 = vrcp.f32 %v2215_v2  ;;  %v2216_v12 = vadd.f32 1.0, %v2987_v8  ;;  %v2180_v19 = vmul.f32 1.442695, %v2128_v3  ;;  %v2085_v24 = vpop.f32.mrf.mxu0  ;;  %v2304_v41 = vmul.f32 %v2985_v59, %v3706_v5 }
 0x3c4   : > { %v2991_v29 = vpop.eup %2990  ;;  %v2305_v57 = vmul.f32 %v2989_v58, %v3709_v1  ;;  %3014 = vpow2.f32 %v2178_v49  ;;  %v2182_v31 = vmul.f32 1.442695, %v2129_v7  ;;  %v2130_v34 = vsub.f32 0.0, %v3764_v11  ;;  %2336 = vadd.xlane.f32.xlu1 %v2335_v28  ;;  %v1924_v2 = vpop.permute.xlu0 %1923 }
 0x3c5   : > { %v2993_v35 = vpop.eup %2992  ;;  %3016 = vrcp.f32 %v2216_v12  ;;  %v2217_v42 = vadd.f32 1.0, %v2991_v29  ;;  %v3769_v39 = vadd.f32 %v2085_v24, %v1909_v60  ;;  %v2089_v44 = vpop.f32.mrf.mxu0 }
 0x3c6   : > { %v2995_v30 = vpop.eup %2994  ;;  %3018 = vpow2.f32 %v2180_v19  ;;  %v2184_v40 = vmul.f32 1.442695, %v2130_v34  ;;  %v3771_v63 = vadd.f32 %v2089_v44, %v1914_v38  ;;  %v2338_v23 = vadd.f32 %v2305_v57, %v2304_v41 }
 0x3c7   : > { %v2997_v1 = vpop.eup %2996  ;;  %3020 = vrcp.f32 %v2217_v42  ;;  %v2218_v10 = vadd.f32 1.0, %v2995_v30  ;;  %v2131_v45 = vsub.f32 0.0, %v3769_v39  ;;  %v2091_v14 = vpop.f32.mrf.mxu0  ;;  %v2306_v20 = vmul.f32 %v2993_v35, %v3712_v15 }
 0x3c8   : > { %v2999_v13 = vpop.eup %2998  ;;  %v2307_v5 = vmul.f32 %v2997_v1, %v3715_v26  ;;  %3022 = vpow2.f32 %v2182_v31  ;;  %v2132_v16 = vsub.f32 0.0, %v3771_v63  ;;  %v3776_v18 = vadd.f32 %v2091_v14, %v1914_v38  ;;  %2339 = vadd.xlane.f32.xlu0 %v2338_v23  ;;  %v1929_v1 = vpop.permute.xlu1 %1928 }
 0x3c9   : > { %3024 = vrcp.f32 %v2218_v10  ;;  %v2219_v46 = vadd.f32 1.0, %v2999_v13  ;;  %v2186_v47 = vmul.f32 1.442695, %v2131_v45  ;;  %v2093_v48 = vpop.f32.mrf.mxu0 }
 0x3ca   : > { %v3001_v50 = vpop.eup %3000  ;;  %3026 = vpow2.f32 %v2184_v40  ;;  %v2188_v52 = vmul.f32 1.442695, %v2132_v16  ;;  %v2133_v53 = vsub.f32 0.0, %v3776_v18  ;;  %v3780_v56 = vadd.f32 %v2093_v48, %v1919_v25 }
 0x3cb   : > { %v3003_v26 = vpop.eup %3002  ;;  %3028 = vrcp.f32 %v2219_v46  ;;  %v2095_v0 = vpop.f32.mrf.mxu0  ;;  %v2341_v62 = vadd.f32 %v2307_v5, %v2306_v20  ;;  %v2308_v3 = vmul.f32 %v3001_v50, %v3718_v33 }
 0x3cc   : > { %v3005_v49 = vpop.eup %3004  ;;  %v2220_v59 = vadd.f32 1.0, %v3003_v26  ;;  %3030 = vpow2.f32 %v2186_v47  ;;  %v2190_v15 = vmul.f32 1.442695, %v2133_v53  ;;  %v2134_v60 = vsub.f32 0.0, %v3780_v56 }
 0x3cd   : > { %v3007_v61 = vpop.eup %3006  ;;  %v2309_v4 = vmul.f32 %v3005_v49, %v3721_v36  ;;  %3032 = vpow2.f32 %v2188_v52  ;;  %v3785_v8 = vadd.f32 %v2095_v0, %v1919_v25  ;;  %2342 = vadd.xlane.f32.xlu0 %v2341_v62  ;;  %v2099_v7 = vpop.f32.mrf.mxu0 }
 0x3ce   : > { %v3009_v58 = vpop.eup %3008  ;;  %3034 = vrcp.f32 %v2220_v59  ;;  %v2221_v12 = vadd.f32 1.0, %v3007_v61  ;;  %v2192_v19 = vmul.f32 1.442695, %v2134_v60  ;;  %v3787_v24 = vadd.f32 %v2099_v7, %v1924_v2 }
 0x3cf   : > { %v3011_v28 = vpop.eup %3010  ;;  %3036 = vpow2.f32 %v2190_v15  ;;  %v2135_v29 = vsub.f32 0.0, %v3785_v8  ;;  %v2101_v57 = vpop.f32.mrf.mxu0  ;;  %v2344_v31 = vadd.f32 %v2309_v4, %v2308_v3  ;;  %v2310_v41 = vmul.f32 %v3009_v58, %v3724_v37 }
 0x3d0   : > { %v3013_v33 = vpop.eup %3012  ;;  %3038 = vrcp.f32 %v2221_v12  ;;  %v2222_v36 = vadd.f32 1.0, %v3011_v28  ;;  %v2136_v34 = vsub.f32 0.0, %v3787_v24  ;;  %v3791_v35 = vadd.f32 %v2101_v57, %v1924_v2 }
 0x3d1   : > { %v3015_v38 = vpop.eup %3014  ;;  %v2311_v42 = vmul.f32 %v3013_v33, %v3726_v21  ;;  %3040 = vpow2.f32 %v2192_v19  ;;  %v2194_v44 = vmul.f32 1.442695, %v2135_v29  ;;  %2345 = vadd.xlane.f32.xlu1 %v2344_v31  ;;  %v2103_v30 = vpop.f32.mrf.mxu0 }
 0x3d2   : > { %v3017_v40 = vpop.eup %3016  ;;  %3042 = vrcp.f32 %v2222_v36  ;;  %v2223_v10 = vadd.f32 1.0, %v3015_v38  ;;  %v2196_v45 = vmul.f32 1.442695, %v2136_v34  ;;  %v2137_v14 = vsub.f32 0.0, %v3791_v35 }
 0x3d3   : > { %v3019_v23 = vpop.eup %3018  ;;  %3044 = vpow2.f32 %v2194_v44  ;;  %v3796_v13 = vadd.f32 %v2103_v30, %v1929_v1  ;;  %v2105_v5 = vpop.f32.mrf.mxu0  ;;  %v2347_v16 = vadd.f32 %v2311_v42, %v2310_v41  ;;  %v2312_v47 = vmul.f32 %v3017_v40, %v3730_v22 }
 0x3d4   : > { %v3021_v37 = vpop.eup %3020  ;;  %3046 = vrcp.f32 %v2223_v10  ;;  %v2224_v21 = vadd.f32 1.0, %v3019_v23  ;;  %v2198_v25 = vmul.f32 1.442695, %v2137_v14  ;;  %v3798_v20 = vadd.f32 %v2105_v5, %v1929_v1 }
 0x3d5   : > { %v3023_v46 = vpop.eup %3022  ;;  %v2313_v48 = vmul.f32 %v3021_v37, %v3733_v55  ;;  %3048 = vpow2.f32 %v2196_v45  ;;  %v2138_v50 = vsub.f32 0.0, %v3796_v13  ;;  %2348 = vadd.xlane.f32.xlu0 %v2347_v16 }
 0x3d6   : > { %v3025_v52 = vpop.eup %3024  ;;  %3050 = vrcp.f32 %v2224_v21  ;;  %v2225_v53 = vadd.f32 1.0, %v3023_v46  ;;  %v2139_v26 = vsub.f32 0.0, %v3798_v20 }
 0x3d7   : > { %v3027_v0 = vpop.eup %3026  ;;  %3052 = vpow2.f32 %v2198_v25  ;;  %v2200_v62 = vmul.f32 1.442695, %v2138_v50  ;;  %v2350_v49 = vadd.f32 %v2313_v48, %v2312_v47  ;;  %v2314_v55 = vmul.f32 %v3025_v52, %v3735_v54 }
 0x3d8   : > { %v3029_v59 = vpop.eup %3028  ;;  %3054 = vrcp.f32 %v2225_v53  ;;  %v2226_v15 = vadd.f32 1.0, %v3027_v0  ;;  %v2202_v60 = vmul.f32 1.442695, %v2139_v26 }
 0x3d9   : > { %v3031_v22 = vpop.eup %3030  ;;  %v2315_v61 = vmul.f32 %v3029_v59, %v3739_v6  ;;  %3056 = vpow2.f32 %v2200_v62  ;;  %2351 = vadd.xlane.f32.xlu1 %v2350_v49 }
 0x3da   : > { %v3033_v2 = vpop.eup %3032  ;;  %3058 = vrcp.f32 %v2226_v15  ;;  %v2227_v3 = vadd.f32 1.0, %v3031_v22 }
 0x3db   : > { %v3035_v4 = vpop.eup %3034  ;;  %v2228_v7 = vadd.f32 1.0, %v3033_v2  ;;  %3060 = vpow2.f32 %v2202_v60  ;;  %v2353_v58 = vadd.f32 %v2315_v61, %v2314_v55 }
 0x3dc   : > { %v3037_v12 = vpop.eup %3036  ;;  %3062 = vrcp.f32 %v2227_v3  ;;  %v2316_v54 = vmul.f32 %v3035_v4, %v3742_v27 }
 0x3dd   : > { %v3039_v19 = vpop.eup %3038  ;;  %3064 = vrcp.f32 %v2228_v7  ;;  %v2229_v28 = vadd.f32 1.0, %v3037_v12  ;;  %2354 = vadd.xlane.f32.xlu0 %v2353_v58 }
 0x3de   : > { %v3041_v29 = vpop.eup %3040  ;;  %v2317_v6 = vmul.f32 %v3039_v19, %v3744_v32 }
 0x3df   : > { %v3043_v57 = vpop.eup %3042  ;;  %3066 = vrcp.f32 %v2229_v28  ;;  %v2230_v31 = vadd.f32 1.0, %v3041_v29  ;;  %v2400_v28 = vld [vmem:[%s3931_s8 + $0x18] sm:$0xff] }
 0x3e0   : > { %v3045_v33 = vpop.eup %3044  ;;  %v2356_v36 = vadd.f32 %v2317_v6, %v2316_v54  ;;  %v2318_v42 = vmul.f32 %v3043_v57, %v3748_v43 }
 0x3e1   : > { %v3047_v34 = vpop.eup %3046  ;;  %3068 = vrcp.f32 %v2230_v31  ;;  %v2231_v38 = vadd.f32 1.0, %v3045_v33  ;;  %v2401_v31 = vld [vmem:[%s3931_s8 + $0x20] sm:$0xff] }
 0x3e2   : > { %v3049_v41 = vpop.eup %3048  ;;  %v2319_v44 = vmul.f32 %v3047_v34, %v3752_v17  ;;  %2357 = vadd.xlane.f32.xlu1 %v2356_v36 }
 0x3e3   : > { %v3051_v30 = vpop.eup %3050  ;;  %3070 = vrcp.f32 %v2231_v38  ;;  %v2232_v40 = vadd.f32 1.0, %v3049_v41  ;;  %v2402_v41 = vld [vmem:[%s3931_s8 + $0x28] sm:$0xff] }
 0x3e4   : > { %v3053_v27 = vpop.eup %3052  ;;  %v2359_v1 = vadd.f32 %v2319_v44, %v2318_v42  ;;  %v2320_v14 = vmul.f32 %v3051_v30, %v3756_v51 }
 0x3e5   : > { %v3055_v32 = vpop.eup %3054  ;;  %3072 = vrcp.f32 %v2232_v40  ;;  %v2233_v10 = vadd.f32 1.0, %v3053_v27 }
 0x3e6   : > { %v3057_v45 = vpop.eup %3056  ;;  %v2321_v23 = vmul.f32 %v3055_v32, %v3759_v9  ;;  %2360 = vadd.xlane.f32.xlu0 %v2359_v1  ;;  %v2403_v32 = vld [vmem:[%s3931_s8 + $0x30] sm:$0xff] }
 0x3e7   : > { %v3059_v5 = vpop.eup %3058  ;;  %3074 = vrcp.f32 %v2233_v10  ;;  %v2234_v43 = vadd.f32 1.0, %v3057_v45 }
 0x3e8   : > { %v3061_v16 = vpop.eup %3060  ;;  %v2362_v17 = vadd.f32 %v2321_v23, %v2320_v14  ;;  %v2322_v46 = vmul.f32 %v3059_v5, %v3764_v11 }
 0x3e9   : > { %v3063_v37 = vpop.eup %3062  ;;  %3076 = vrcp.f32 %v2234_v43  ;;  %v2235_v21 = vadd.f32 1.0, %v3061_v16  ;;  %v2404_v43 = vld [vmem:[%s3931_s8 + $0x38] sm:$0xff] }
 0x3ea   : > { %v3065_v25 = vpop.eup %3064  ;;  %v2323_v47 = vmul.f32 %v3063_v37, %v3769_v39  ;;  %2363 = vadd.xlane.f32.xlu1 %v2362_v17 }
 0x3eb   : > { %3078 = vrcp.f32 %v2235_v21  ;;  %v2324_v9 = vmul.f32 %v3065_v25, %v3771_v63 }
 0x3ec   : > { %v3067_v48 = vpop.eup %3066  ;;  %v2365_v51 = vadd.f32 %v2323_v47, %v2322_v46  ;;  %v2405_v46 = vld [vmem:[%s3931_s8 + $0x40] sm:$0xff] }
 0x3ed   : > { %v2325_v50 = vmul.f32 %v3067_v48, %v3776_v18 }
 0x3ee   : > { %v3069_v52 = vpop.eup %3068  ;;  %2366 = vadd.xlane.f32.xlu0 %v2365_v51 }
 0x3ef   : > { %v2368_v53 = vadd.f32 %v2325_v50, %v2324_v9  ;;  %v2326_v0 = vmul.f32 %v3069_v52, %v3780_v56  ;;  %v2406_v52 = vld [vmem:[%s3931_s8 + $0x48] sm:$0xff] }
 0x3f0   : > { %v3071_v26 = vpop.eup %3070 }
 0x3f1   : > { %v2327_v62 = vmul.f32 %v3071_v26, %v3785_v8  ;;  %2369 = vadd.xlane.f32.xlu1 %v2368_v53 }
 0x3f2   : > { %v3073_v11 = vpop.eup %3072 }
 0x3f3   : > { %v2371_v49 = vadd.f32 %v2327_v62, %v2326_v0  ;;  %v2328_v59 = vmul.f32 %v3073_v11, %v3787_v24  ;;  %v2398_v24 = vld [vmem:[%s3931_s8 + $0x8] sm:$0xff] }
 0x3f4   : > { %v3075_v39 = vpop.eup %3074 }
 0x3f5   : > { %v2329_v15 = vmul.f32 %v3075_v39, %v3791_v35  ;;  %2372 = vadd.xlane.f32.xlu0 %v2371_v49  ;;  %v2407_v49 = vld [vmem:[%s3931_s8 + $0x50] sm:$0xff] }
 0x3f6   : > { %v3077_v63 = vpop.eup %3076 }
 0x3f7   : > { %v2374_v60 = vadd.f32 %v2329_v15, %v2328_v59  ;;  %v2330_v22 = vmul.f32 %v3077_v63, %v3796_v13  ;;  %v2397_v13 = vld [vmem:[%s3931_s8] sm:$0xff] }
 0x3f8   : > { %v3079_v18 = vpop.eup %3078 }
 0x3f9   : > { %v2331_v55 = vmul.f32 %v3079_v18, %v3798_v20  ;;  %2375 = vadd.xlane.f32.xlu1 %v2374_v60  ;;  %v2399_v20 = vld [vmem:[%s3931_s8 + $0x10] sm:$0xff]  ;;  %v2408_v60 = vld [vmem:[%s3931_s8 + $0x58] sm:$0xff] }
 0x3fb   : > { %v2377_v56 = vadd.f32 %v2331_v55, %v2330_v22 }
 0x3fd   : > { %2378 = vadd.xlane.f32.xlu0 %v2377_v56 }
 0x44a   : > { %v2334_v8 = vpop.xlane.xlu0 %2333 }
 0x44b   : > { %v2381_v4 = vmul.f32 0.00390625, %v2334_v8 }
 0x44d   : > { %v2337_v2 = vpop.xlane.xlu1 %2336  ;;  %v2413_v54 = vmul.f32 %v2397_v13, %v2381_v4 }
 0x44e   : > { %v2382_v3 = vmul.f32 0.00390625, %v2337_v2 }
 0x44f   : > { %v2430_v44 = vsel %vm2429_vm12, %v2413_v54, 0.0 }
 0x450   : > { %v2414_v12 = vmul.f32 %v2398_v24, %v2382_v3 }
 0x451   : > { %v2340_v61 = vpop.xlane.xlu0 %2339 }
 0x452   : > { %v2383_v7 = vmul.f32 0.00390625, %v2340_v61  ;;  %v2431_v36 = vsel %vm2429_vm12, %v2414_v12, 0.0  ;;  %v2409_v61 = vld [vmem:[%s3931_s8 + $0x60] sm:$0xff] }
 0x453   : > { %v2432_v1 = vadd.f32 %v2431_v36, %v2430_v44 }
 0x454   : > { %v2415_v6 = vmul.f32 %v2399_v20, %v2383_v7 }
 0x456   : > { %v2343_v35 = vpop.xlane.xlu0 %2342  ;;  %v2433_v30 = vsel %vm2429_vm12, %v2415_v6, 0.0 }
 0x457   : > { %v2384_v19 = vmul.f32 0.00390625, %v2343_v35  ;;  %v2434_v5 = vadd.f32 %v2433_v30, %v2432_v1  ;;  %v2410_v35 = vld [vmem:[%s3931_s8 + $0x68] sm:$0xff] }
 0x459   : > { %v2416_v34 = vmul.f32 %v2400_v28, %v2384_v19 }
 0x45a   : > { %v2346_v58 = vpop.xlane.xlu1 %2345 }
 0x45b   : > { %v2385_v57 = vmul.f32 0.00390625, %v2346_v58  ;;  %v2435_v45 = vsel %vm2429_vm12, %v2416_v34, 0.0 }
 0x45c   : > { %v2436_v25 = vadd.f32 %v2435_v45, %v2434_v5 }
 0x45d   : > { %v2417_v40 = vmul.f32 %v2401_v31, %v2385_v57 }
 0x45e   : > { %v2349_v29 = vpop.xlane.xlu0 %2348 }
 0x45f   : > { %v2386_v38 = vmul.f32 0.00390625, %v2349_v29  ;;  %v2437_v17 = vsel %vm2429_vm12, %v2417_v40, 0.0  ;;  %v2411_v29 = vld [vmem:[%s3931_s8 + $0x70] sm:$0xff] }
 0x460   : > { %v2438_v50 = vadd.f32 %v2437_v17, %v2436_v25 }
 0x461   : > { %v2418_v14 = vmul.f32 %v2402_v41, %v2386_v38  ;;  %v2412_v38 = vld [vmem:[%s3931_s8 + $0x78] sm:$0xff] }
 0x462   : > { %v2352_v33 = vpop.xlane.xlu1 %2351 }
 0x463   : > { %v2387_v27 = vmul.f32 0.00390625, %v2352_v33  ;;  %v2439_v48 = vsel %vm2429_vm12, %v2418_v14, 0.0 }
 0x464   : > { %v2440_v11 = vadd.f32 %v2439_v48, %v2438_v50 }
 0x465   : > { %v2419_v37 = vmul.f32 %v2403_v32, %v2387_v27 }
 0x466   : > { %v2355_v42 = vpop.xlane.xlu0 %2354 }
 0x467   : > { %v2388_v23 = vmul.f32 0.00390625, %v2355_v42  ;;  %v2441_v53 = vsel %vm2429_vm12, %v2419_v37, 0.0 }
 0x468   : > { %v2442_v63 = vadd.f32 %v2441_v53, %v2440_v11 }
 0x469   : > { %v2420_v51 = vmul.f32 %v2404_v43, %v2388_v23  ;;  %v2467_v43 = vld [vmem:[%s3932_s9] sm:$0x1] }
 0x46b   : > { %v2358_v10 = vpop.xlane.xlu1 %2357  ;;  %v2443_v39 = vsel %vm2429_vm12, %v2420_v51, 0.0 }
 0x46c   : > { %v2389_v21 = vmul.f32 0.00390625, %v2358_v10  ;;  %v2444_v8 = vadd.f32 %v2443_v39, %v2442_v63 }
 0x46e   : > { %v2421_v26 = vmul.f32 %v2405_v46, %v2389_v21 }
 0x46f   : > { %v2361_v16 = vpop.xlane.xlu0 %2360 }
 0x470   : > { %v2390_v9 = vmul.f32 0.00390625, %v2361_v16  ;;  %v2445_v22 = vsel %vm2429_vm12, %v2421_v26, 0.0 }
 0x471   : > { %v2446_v24 = vadd.f32 %v2445_v22, %v2444_v8 }
 0x472   : > { %v2422_v59 = vmul.f32 %v2406_v52, %v2390_v9 }
 0x473   : > { %v2364_v47 = vpop.xlane.xlu1 %2363 }
 0x474   : > { %v2391_v0 = vmul.f32 0.00390625, %v2364_v47  ;;  %v2447_v2 = vsel %vm2429_vm12, %v2422_v59, 0.0 }
 0x475   : > { %v2448_v58 = vadd.f32 %v2447_v2, %v2446_v24 }
 0x476   : > { %v2423_v55 = vmul.f32 %v2407_v49, %v2391_v0 }
 0x477   : > { %v2367_v62 = vpop.xlane.xlu0 %2366 }
 0x478   : > { %v2392_v15 = vmul.f32 0.00390625, %v2367_v62  ;;  %v2449_v7 = vsel %vm2429_vm12, %v2423_v55, 0.0 }
 0x479   : > { %v2450_v28 = vadd.f32 %v2449_v7, %v2448_v58 }
 0x47a   : > { %v2370_v18 = vpop.xlane.xlu1 %2369  ;;  %v2424_v3 = vmul.f32 %v2408_v60, %v2392_v15 }
 0x47b   : > { %v2393_v56 = vmul.f32 0.00390625, %v2370_v18 }
 0x47c   : > { %v2451_v12 = vsel %vm2429_vm12, %v2424_v3, 0.0 }
 0x47d   : > { %v2425_v13 = vmul.f32 %v2409_v61, %v2393_v56  ;;  %v2452_v31 = vadd.f32 %v2451_v12, %v2450_v28 }
 0x47e   : > { %v2373_v4 = vpop.xlane.xlu0 %2372 }
 0x47f   : > { %v2394_v20 = vmul.f32 0.00390625, %v2373_v4  ;;  %v2453_v6 = vsel %vm2429_vm12, %v2425_v13, 0.0 }
 0x480   : > { %v2454_v34 = vadd.f32 %v2453_v6, %v2452_v31 }
 0x481   : > { %v2426_v19 = vmul.f32 %v2410_v35, %v2394_v20 }
 0x482   : > { %v2376_v54 = vpop.xlane.xlu1 %2375 }
 0x483   : > { %v2395_v57 = vmul.f32 0.00390625, %v2376_v54  ;;  %v2455_v33 = vsel %vm2429_vm12, %v2426_v19, 0.0 }
 0x484   : > { %v2456_v30 = vadd.f32 %v2455_v33, %v2454_v34 }
 0x485   : > { %v2427_v36 = vmul.f32 %v2411_v29, %v2395_v57 }
 0x486   : > { %v2379_v41 = vpop.xlane.xlu0 %2378 }
 0x487   : > { %v2457_v42 = vsel %vm2429_vm12, %v2427_v36, 0.0  ;;  %v2396_v44 = vmul.f32 0.00390625, %v2379_v41 }
 0x488   : > { %v2458_v27 = vadd.f32 %v2457_v42, %v2456_v30 }
 0x489   : > { %v2428_v40 = vmul.f32 %v2412_v38, %v2396_v44 }
 0x48b   : > { %v2459_v1 = vsel %vm2429_vm12, %v2428_v40, 0.0 }
 0x48c   : > { %v2460_v32 = vadd.f32 %v2459_v1, %v2458_v27 }
 0x48e   : > { %v2461_v10 = vrot.slane %v2460_v32, 4 }
 0x490   : > { %v2462_v45 = vadd.f32 %v2461_v10, %v2460_v32 }
 0x492   : > { %v2463_v14 = vrot.slane %v2462_v45, 2 }
 0x494   : > { %v2464_v23 = vadd.f32 %v2463_v14, %v2462_v45 }
 0x496   : > { %v2465_v5 = vrot.slane %v2464_v23, 1 }
 0x498   : > { %v2466_v16 = vadd.f32 %v2465_v5, %v2464_v23 }
 0x49a   : > { %v2468_v17 = vadd.f32 %v2467_v43, %v2466_v16 }
 0x49c   : > { %2470 = vst.msk [vmem:[%s351_s15] sm:$0x1] %vm2469_vm13, %v2468_v17 }
 0x49d   : > { %3093 = shalt.err (!%p3090_p3)
}
 0x49e   : > { %s3094_s26 = scalar_lea.hbm %s2482_s11, 16  ;;  %s3098_s27 = scalar_lea.hbm %s3933_s10, 32 }
 0x49f   : > { %p3095_p4 = scmp.ne.s32.totalorder %s2482_s11, %s3094_s26  ;;  %p3099_p9 = scmp.lt.s32.totalorder %s2482_s11, %s3933_s10 }
 0x4a0   : > { %p3100_p10 = scmp.lt.s32.totalorder %s3098_s27, %s3094_s26 }
 0x4a1   : > { %p3096_p7 = pnand %p3095_p4, %p3247_p5 }
 0x4a2   : > { %p3101_p11 = por %p3100_p10, %p3099_p9 }
 0x4a3   : > { %p3097_p8 = pneg %p3096_p7 }
 0x4a5   : > { %p3102_p12 = pnand %p3101_p11, %p3097_p8 }
 0x4a7   : > { %3105 = shalt.err (!%p3102_p12)
}
 0x4a8   : > { %2658 = dma.vmem_to_hbm [thread:$0]  (%p3247_p5), %s2485_s28, 16, %s2482_s11, %s2472_s12  }
 0x4a9 PF: > { %p2664_p13 = scmp.ge.s32.totalorder %s3140_s16, 2  ;;  %s2496_s30 = sand.u32 1, %s3128_s13  }
 0x4aa   : > { %s2497_s18 = scalar_lea.sflag [#allocation4], %s2496_s30 }
 0x4ab   : > { %p2661_p0 = pnand %p2664_p13, %p3251_p6 }
 0x4ad   : > { %p2662_p1 = pneg %p2661_p0 }
 0x4af   : > { %3123 = dma.done.wait (%p2662_p1), %s2497_s18, 16  }
 0x4b0   : > { %3125 = vsyncadd (%p2662_p1), %s2497_s18, 4294967280  ;;  %s3939_s20 = sld [smem:[#allocation6_spill]]  ;;  %p20_p2 = scmp.ge.s32.totalorder %s3234_s19, 4  }
 0x4b1   : > { %s3940_s15 = sld [smem:[#allocation7_spill]]  ;;  %s3941_s13 = smov %s3132_s14 }
 0x4b2   : > { %s3943_s16 = smov %s3234_s19  ;;  %22 = sbr.rel (!%p20_p2) target bundleno = 3 (0x3), region = 95 }
 0x4b6   : > { %s3942_s14 = smov %s3939_s20 }
 0x4b7   :  { %2501 = vsyncpa [#allocation4], 1 }
 0x4b8   :  { %2503 = vsyncpa [#allocation4 + $0x1], 1 }

</bundles_post_ra>
